<compile_context>
chip_gen: v5e
topology: v5e:2x2
jax: 0.10.0
libtpu: 0.0.40
codegen_flags: <defaults>
</compile_context>

<pallas_src>
import functools
import math

import jax
import jax.numpy as jnp
from jax.experimental import pallas as pl
from jax.experimental.pallas import tpu as pltpu

_VMEM_LIMIT = 32 * 1024 * 1024
_LN_EPS = 1e-5


def _cparams(*sems):
    return pltpu.CompilerParams(dimension_semantics=tuple(sems),
                                vmem_limit_bytes=_VMEM_LIMIT)


def _pick_tile(dim, target, align):
    """Largest multiple of `align` dividing `dim` that is <= target,
    else the full dim (full extent is always a legal block)."""
    if dim <= target:
        return dim
    t = (target // align) * align
    while t >= align:
        if dim % t == 0:
            return t
        t -= align
    return dim


def _ln_rows(x, g, b):
    mean = jnp.mean(x, axis=-1, keepdims=True)
    var = jnp.mean(jnp.square(x - mean), axis=-1, keepdims=True)
    return (x - mean) * jax.lax.rsqrt(var + _LN_EPS) * g + b


# ----------------------------- Pallas kernels -----------------------------

def _add_pos_kernel(x_ref, p_ref, o_ref):
    o_ref[...] = x_ref[...] + p_ref[...]


def add_positional(x, pos):
    B, S, D = x.shape
    return pl.pallas_call(
        _add_pos_kernel,
        grid=(B,),
        out_shape=jax.ShapeDtypeStruct((B, S, D), x.dtype),
        in_specs=[pl.BlockSpec((None, S, D), lambda b: (b, 0, 0)),
                  pl.BlockSpec((S, D), lambda b: (0, 0))],
        out_specs=pl.BlockSpec((None, S, D), lambda b: (b, 0, 0)),
        compiler_params=_cparams("parallel"),
    )(x, pos)


def _ln_linear_kernel(x_ref, g_ref, b_ref, w_ref, bias_ref, o_ref):
    # fused LayerNorm (over full K) + matmul tile + bias
    h = _ln_rows(x_ref[...].astype(jnp.float32), g_ref[...], b_ref[...])
    y = jnp.dot(h, w_ref[...], preferred_element_type=jnp.float32) + bias_ref[...]
    o_ref[...] = y.astype(o_ref.dtype)


def ln_linear(x, gamma, beta, w, bias, *, tn_target=512):
    B, S, K = x.shape
    N = w.shape[1]
    tn = _pick_tile(N, tn_target, 128)
    return pl.pallas_call(
        _ln_linear_kernel,
        grid=(B, N // tn),
        out_shape=jax.ShapeDtypeStruct((B, S, N), x.dtype),
        in_specs=[pl.BlockSpec((None, S, K), lambda b, j: (b, 0, 0)),
                  pl.BlockSpec((1, K), lambda b, j: (0, 0)),
                  pl.BlockSpec((1, K), lambda b, j: (0, 0)),
                  pl.BlockSpec((K, tn), lambda b, j: (0, j)),
                  pl.BlockSpec((1, tn), lambda b, j: (0, j))],
        out_specs=pl.BlockSpec((None, S, tn), lambda b, j: (b, 0, j)),
        compiler_params=_cparams("parallel", "parallel"),
    )(x, gamma.reshape(1, K), beta.reshape(1, K), w, bias.reshape(1, N))


def _attention_kernel(qkv_ref, m_ref, o_ref, *, n_heads, scale):
    S, threeD = qkv_ref.shape
    D = threeD // 3
    Dh = D // n_heads
    qkv = qkv_ref[...].astype(jnp.float32)
    mask = m_ref[...]
    outs = []
    for h in range(n_heads):                      # small static unroll over heads
        q = qkv[:, h * Dh:(h + 1) * Dh]
        k = qkv[:, D + h * Dh:D + (h + 1) * Dh]
        v = qkv[:, 2 * D + h * Dh:2 * D + (h + 1) * Dh]
        s = jax.lax.dot_general(q, k, (((1,), (1,)), ((), ())),
                                preferred_element_type=jnp.float32) * scale
        s = s + mask                              # finite -1e30 causal mask
        s = s - jnp.max(s, axis=-1, keepdims=True)
        p = jnp.exp(s)
        p = p * pl.reciprocal(jnp.sum(p, axis=-1, keepdims=True))
        outs.append(jnp.dot(p, v, preferred_element_type=jnp.float32))
    # concatenate heads -> one lane-dense (S, D) store (head h at cols h*Dh)
    o_ref[...] = jnp.concatenate(outs, axis=-1).astype(o_ref.dtype)


def attention(qkv, mask, n_heads, scale):
    B, S, threeD = qkv.shape
    D = threeD // 3
    return pl.pallas_call(
        functools.partial(_attention_kernel, n_heads=n_heads, scale=scale),
        grid=(B,),
        out_shape=jax.ShapeDtypeStruct((B, S, D), qkv.dtype),
        in_specs=[pl.BlockSpec((None, S, threeD), lambda b: (b, 0, 0)),
                  pl.BlockSpec((S, S), lambda b: (0, 0))],
        out_specs=pl.BlockSpec((None, S, D), lambda b: (b, 0, 0)),
        compiler_params=_cparams("parallel"),
    )(qkv, mask)


def _linear_residual_kernel(a_ref, w_ref, bias_ref, res_ref, o_ref):
    y = jnp.dot(a_ref[...].astype(jnp.float32), w_ref[...],
                preferred_element_type=jnp.float32)
    o_ref[...] = (y + bias_ref[...] + res_ref[...]).astype(o_ref.dtype)


def linear_residual(a, w, bias, res, *, tn_target=512):
    B, S, K = a.shape
    N = w.shape[1]
    tn = _pick_tile(N, tn_target, 128)
    return pl.pallas_call(
        _linear_residual_kernel,
        grid=(B, N // tn),
        out_shape=jax.ShapeDtypeStruct((B, S, N), a.dtype),
        in_specs=[pl.BlockSpec((None, S, K), lambda b, j: (b, 0, 0)),
                  pl.BlockSpec((K, tn), lambda b, j: (0, j)),
                  pl.BlockSpec((1, tn), lambda b, j: (0, j)),
                  pl.BlockSpec((None, S, tn), lambda b, j: (b, 0, j))],
        out_specs=pl.BlockSpec((None, S, tn), lambda b, j: (b, 0, j)),
        compiler_params=_cparams("parallel", "parallel"),
    )(a, w, bias.reshape(1, N), res)


def _mlp_kernel(x_ref, g_ref, b_ref, wfc_ref, bfc_ref, wpj_ref, bpj_ref, o_ref):
    # fused LN2 + c_fc + QuickGELU + c_proj + residual; the 4D-wide fc
    # activation lives only in VMEM.
    x = x_ref[...].astype(jnp.float32)
    h = _ln_rows(x, g_ref[...], b_ref[...])
    h = jnp.dot(h, wfc_ref[...], preferred_element_type=jnp.float32) + bfc_ref[...]
    h = h * jax.nn.sigmoid(1.702 * h)                       # CLIP QuickGELU
    y = jnp.dot(h, wpj_ref[...], preferred_element_type=jnp.float32) + bpj_ref[...]
    o_ref[...] = (x + y).astype(o_ref.dtype)                # residual add


def mlp_block(x, gamma, beta, w_fc, b_fc, w_proj, b_proj):
    B, S, D = x.shape
    F = w_fc.shape[1]
    return pl.pallas_call(
        _mlp_kernel,
        grid=(B,),
        out_shape=jax.ShapeDtypeStruct((B, S, D), x.dtype),
        in_specs=[pl.BlockSpec((None, S, D), lambda b: (b, 0, 0)),
                  pl.BlockSpec((1, D), lambda b: (0, 0)),
                  pl.BlockSpec((1, D), lambda b: (0, 0)),
                  pl.BlockSpec((D, F), lambda b: (0, 0)),
                  pl.BlockSpec((1, F), lambda b: (0, 0)),
                  pl.BlockSpec((F, D), lambda b: (0, 0)),
                  pl.BlockSpec((1, D), lambda b: (0, 0))],
        out_specs=pl.BlockSpec((None, S, D), lambda b: (b, 0, 0)),
        compiler_params=_cparams("parallel"),
    )(x, gamma.reshape(1, D), beta.reshape(1, D), w_fc, b_fc.reshape(1, F),
      w_proj, b_proj.reshape(1, D))


def _ln_proj_kernel(x_ref, g_ref, b_ref, w_ref, o_ref):
    h = _ln_rows(x_ref[...].astype(jnp.float32), g_ref[...], b_ref[...])
    o_ref[...] = jnp.dot(h, w_ref[...],
                         preferred_element_type=jnp.float32).astype(o_ref.dtype)


def ln_project(x, gamma, beta, w, *, tm_target=256, tn_target=512):
    # fused final LayerNorm + text projection (no bias) on the EOT rows only
    M, K = x.shape
    N = w.shape[1]
    tm = _pick_tile(M, tm_target, 8)
    tn = _pick_tile(N, tn_target, 128)
    return pl.pallas_call(
        _ln_proj_kernel,
        grid=(M // tm, N // tn),
        out_shape=jax.ShapeDtypeStruct((M, N), x.dtype),
        in_specs=[pl.BlockSpec((tm, K), lambda i, j: (i, 0)),
                  pl.BlockSpec((1, K), lambda i, j: (0, 0)),
                  pl.BlockSpec((1, K), lambda i, j: (0, 0)),
                  pl.BlockSpec((K, tn), lambda i, j: (0, j))],
        out_specs=pl.BlockSpec((tm, tn), lambda i, j: (i, j)),
        compiler_params=_cparams("parallel", "parallel"),
    )(x, gamma.reshape(1, K), beta.reshape(1, K), w)


# ----------------------------- model wiring -----------------------------

def residual_attention_block(x, p, n_heads, mask):
    D = x.shape[-1]
    Dh = D // n_heads
    qkv = ln_linear(x, p['ln1_g'], p['ln1_b'], p['attn_in_w'], p['attn_in_b'])
    a = attention(qkv, mask, n_heads, 1.0 / math.sqrt(Dh))
    x = linear_residual(a, p['attn_out_w'], p['attn_out_b'], x)
    x = mlp_block(x, p['ln2_g'], p['ln2_b'], p['fc_w'], p['fc_b'],
                  p['proj_w'], p['proj_b'])
    return x


def text_encoder_forward(x, tokenized_prompts, params, n_heads):
    B = x.shape[0]
    x = add_positional(x, params['pos_emb'])
    for lp in params['layers']:
        x = residual_attention_block(x, lp, n_heads, params['attn_mask'])
    # Gather the EOT rows BEFORE the final LN/projection (LN is row-wise, so
    # this is numerically identical and ~S x cheaper).
    # TODO(synk): the data-dependent row gather stays as XLA glue.
    eot = jnp.argmax(tokenized_prompts, axis=-1)
    x_eot = x[jnp.arange(B), eot]                              # [B, D]
    return ln_project(x_eot, params['lnf_g'], params['lnf_b'],
                      params['text_proj'])                     # [B, P]


def init_params(key, seq, dim, n_heads, n_layers, proj_dim):
    keys = jax.random.split(key, 2 + n_layers)
    params = {
        'pos_emb': 0.02 * jax.random.normal(keys[0], (seq, dim), jnp.float32),
        'lnf_g': jnp.ones((dim,), jnp.float32),
        'lnf_b': jnp.zeros((dim,), jnp.float32),
        'text_proj': (dim ** -0.5)
        * jax.random.normal(keys[1], (dim, proj_dim), jnp.float32),
        # CLIP build_attention_mask: large-negative strictly above the diagonal
        # (finite -1e30, robust to bf16 / fused reorderings)
        'attn_mask': jnp.triu(jnp.full((seq, seq), -1e30, jnp.float32), k=1),
        'layers': [],
    }
    s = 0.02
    for l in range(n_layers):
        lk = jax.random.split(keys[2 + l], 4)
        params['layers'].append({
            'ln1_g': jnp.ones((dim,), jnp.float32),
            'ln1_b': jnp.zeros((dim,), jnp.float32),
            'attn_in_w': s * jax.random.normal(lk[0], (dim, 3 * dim), jnp.float32),
            'attn_in_b': jnp.zeros((3 * dim,), jnp.float32),
            'attn_out_w': s * jax.random.normal(lk[1], (dim, dim), jnp.float32),
            'attn_out_b': jnp.zeros((dim,), jnp.float32),
            'ln2_g': jnp.ones((dim,), jnp.float32),
            'ln2_b': jnp.zeros((dim,), jnp.float32),
            'fc_w': s * jax.random.normal(lk[2], (dim, 4 * dim), jnp.float32),
            'fc_b': jnp.zeros((4 * dim,), jnp.float32),
            'proj_w': s * jax.random.normal(lk[3], (4 * dim, dim), jnp.float32),
            'proj_b': jnp.zeros((dim,), jnp.float32),
        })
    return params


# ----------------------------- pure-JAX reference -----------------------------

def _ref_forward(x, tok, params, n_heads):
    def ln(x, g, b, eps=_LN_EPS):
        m = jnp.mean(x, -1, keepdims=True)
        v = jnp.mean((x - m) ** 2, -1, keepdims=True)
        return (x - m) / jnp.sqrt(v + eps) * g + b

    B, S, D = x.shape
    Dh = D // n_heads
    x = x + params['pos_emb']
    mask = params['attn_mask']
    for p in params['layers']:
        h = ln(x, p['ln1_g'], p['ln1_b'])
        qkv = h @ p['attn_in_w'] + p['attn_in_b']
        q, k, v = jnp.split(qkv, 3, axis=-1)
        hs = lambda t: t.reshape(B, S, n_heads, Dh).transpose(0, 2, 1, 3)
        q, k, v = hs(q), hs(k), hs(v)
        s = (q @ k.transpose(0, 1, 3, 2)) / math.sqrt(Dh) + mask
        a = jax.nn.softmax(s, axis=-1) @ v
        a = a.transpose(0, 2, 1, 3).reshape(B, S, D)
        x = x + (a @ p['attn_out_w'] + p['attn_out_b'])
        h = ln(x, p['ln2_g'], p['ln2_b'])
        h = h @ p['fc_w'] + p['fc_b']
        h = h * jax.nn.sigmoid(1.702 * h)
        x = x + (h @ p['proj_w'] + p['proj_b'])
    x = ln(x, params['lnf_g'], params['lnf_b'])
    eot = jnp.argmax(tok, axis=-1)
    return x[jnp.arange(B), eot] @ params['text_proj']


if __name__ == "__main__":
    B, S, D, H, L, P = 2, 8, 32, 4, 2, 16
    key = jax.random.PRNGKey(0)
    kp, kx = jax.random.split(key, 2)
    params = init_params(kp, S, D, H, L, P)
    x = jax.random.normal(kx, (B, S, D), jnp.float32)
    # synthetic CLIP token ids; the EOT token (largest id, 49407) sits at
    # different positions, exercising the argmax gather.
    tokenized_prompts = jnp.array(
        [[49406, 320, 1125, 539, 49407, 0, 0, 0],
         [49406, 320, 1125, 539, 320, 2368, 49407, 0]], dtype=jnp.int32)

    fwd = jax.jit(functools.partial(text_encoder_forward, n_heads=H))
    out = fwd(x, tokenized_prompts, params)
    out = jax.block_until_ready(out)

    ref = _ref_forward(x, tokenized_prompts, params, H)
    assert out.shape == (B, P), out.shape
    err = float(jnp.max(jnp.abs(out - ref)))
    assert jnp.allclose(out, ref, atol=1e-4, rtol=1e-4), f"max abs err {err}"
    print("KERNEL_OK")
</pallas_src>

<mosaic_0001>
module attributes {stable_mosaic.version = 11 : i64} {
  func.func @_add_pos_kernel(%arg0: i32, %arg1: memref<1x8x32xf32, #tpu.memory_space<vmem>>, %arg2: memref<8x32xf32, #tpu.memory_space<vmem>>, %arg3: memref<1x8x32xf32, #tpu.memory_space<vmem>>) attributes {dimension_semantics = [#tpu.dimension_semantics<parallel>], iteration_bounds = array<i64: 2>, scalar_prefetch = 0 : i64, scratch_operands = 0 : i64, tpu.core_type = #tpu.core_type<tc>, window_params = [{transform_indices = @transform_0, window_bounds = array<i64: 1, 8, 32>}, {pipeline_mode = #tpu.pipeline_mode<synchronous>, transform_indices = @transform_1, window_bounds = array<i64: 8, 32>}, {transform_indices = @transform_2, window_bounds = array<i64: 1, 8, 32>}]} {
    %c0 = arith.constant 0 : index
    %c0_0 = arith.constant 0 : index
    %c0_1 = arith.constant 0 : index
    %0 = vector.load %arg1[%c0, %c0_0, %c0_1] : memref<1x8x32xf32, #tpu.memory_space<vmem>>, vector<1x8x32xf32>
    %1 = vector.shape_cast %0 : vector<1x8x32xf32> to vector<8x32xf32>
    %c0_2 = arith.constant 0 : index
    %c0_3 = arith.constant 0 : index
    %2 = vector.load %arg2[%c0_2, %c0_3] : memref<8x32xf32, #tpu.memory_space<vmem>>, vector<8x32xf32>
    %3 = arith.addf %1, %2 : vector<8x32xf32>
    %c0_4 = arith.constant 0 : index
    %c0_5 = arith.constant 0 : index
    %c0_6 = arith.constant 0 : index
    %4 = vector.load %arg3[%c0_4, %c0_5, %c0_6] : memref<1x8x32xf32, #tpu.memory_space<vmem>>, vector<1x8x32xf32>
    %5 = vector.shape_cast %4 : vector<1x8x32xf32> to vector<8x32xf32>
    %6 = vector.shape_cast %3 : vector<8x32xf32> to vector<1x8x32xf32>
    tpu.vector_store %arg3[%c0_4, %c0_5, %c0_6], %6 {strides = array<i32>} : memref<1x8x32xf32, #tpu.memory_space<vmem>>, vector<1x8x32xf32>,
    return
  }
  func.func @transform_0(%arg0: i32) -> (i32, i32, i32) {
    %c0_i32 = arith.constant 0 : i32
    %c0_i32_0 = arith.constant 0 : i32
    %c0_i32_1 = arith.constant 0 : i32
    return %arg0, %c0_i32, %c0_i32_0 : i32, i32, i32
  }
  func.func @transform_1(%arg0: i32) -> (i32, i32) {
    %c0_i32 = arith.constant 0 : i32
    %c0_i32_0 = arith.constant 0 : i32
    %c0_i32_1 = arith.constant 0 : i32
    return %c0_i32, %c0_i32_0 : i32, i32
  }
  func.func @transform_2(%arg0: i32) -> (i32, i32, i32) {
    %c0_i32 = arith.constant 0 : i32
    %c0_i32_0 = arith.constant 0 : i32
    %c0_i32_1 = arith.constant 0 : i32
    return %arg0, %c0_i32, %c0_i32_0 : i32, i32, i32
  }
}

module attributes {stable_mosaic.version = 11 : i64} {
  func.func @_ln_linear_kernel(%arg0: i32, %arg1: i32, %arg2: memref<1x8x32xf32, #tpu.memory_space<vmem>>, %arg3: memref<1x32xf32, #tpu.memory_space<vmem>>, %arg4: memref<1x32xf32, #tpu.memory_space<vmem>>, %arg5: memref<32x96xf32, #tpu.memory_space<vmem>>, %arg6: memref<1x96xf32, #tpu.memory_space<vmem>>, %arg7: memref<1x8x96xf32, #tpu.memory_space<vmem>>) attributes {dimension_semantics = [#tpu.dimension_semantics<parallel>, #tpu.dimension_semantics<parallel>], iteration_bounds = array<i64: 2, 1>, scalar_prefetch = 0 : i64, scratch_operands = 0 : i64, tpu.core_type = #tpu.core_type<tc>, window_params = [{transform_indices = @transform_0, window_bounds = array<i64: 1, 8, 32>}, {pipeline_mode = #tpu.pipeline_mode<synchronous>, transform_indices = @transform_1, window_bounds = array<i64: 1, 32>}, {pipeline_mode = #tpu.pipeline_mode<synchronous>, transform_indices = @transform_2, window_bounds = array<i64: 1, 32>}, {transform_indices = @transform_3, window_bounds = array<i64: 32, 96>}, {transform_indices = @transform_4, window_bounds = array<i64: 1, 96>}, {transform_indices = @transform_5, window_bounds = array<i64: 1, 8, 96>}]} {
    %c0 = arith.constant 0 : index
    %c0_0 = arith.constant 0 : index
    %c0_1 = arith.constant 0 : index
    %0 = vector.load %arg2[%c0, %c0_0, %c0_1] : memref<1x8x32xf32, #tpu.memory_space<vmem>>, vector<1x8x32xf32>
    %1 = vector.shape_cast %0 : vector<1x8x32xf32> to vector<8x32xf32>
    %c0_2 = arith.constant 0 : index
    %c0_3 = arith.constant 0 : index
    %2 = vector.load %arg3[%c0_2, %c0_3] : memref<1x32xf32, #tpu.memory_space<vmem>>, vector<1x32xf32>
    %c0_4 = arith.constant 0 : index
    %c0_5 = arith.constant 0 : index
    %3 = vector.load %arg4[%c0_4, %c0_5] : memref<1x32xf32, #tpu.memory_space<vmem>>, vector<1x32xf32>
    %cst = arith.constant dense<0.000000e+00> : vector<8xf32>
    %4 = vector.multi_reduction <add>, %1, %cst [1] : vector<8x32xf32> to vector<8xf32>
    %5 = vector.shape_cast %4 : vector<8xf32> to vector<8x1xf32>
    %cst_6 = arith.constant 3.200000e+01 : f32
    %6 = vector.broadcast %cst_6 : f32 to vector<8x1xf32>
    %7 = arith.divf %5, %6 : vector<8x1xf32>
    %8 = vector.broadcast %7 : vector<8x1xf32> to vector<8x32xf32>
    %9 = arith.subf %1, %8 : vector<8x32xf32>
    %10 = arith.mulf %9, %9 : vector<8x32xf32>
    %cst_7 = arith.constant dense<0.000000e+00> : vector<8xf32>
    %11 = vector.multi_reduction <add>, %10, %cst_7 [1] : vector<8x32xf32> to vector<8xf32>
    %12 = vector.shape_cast %11 : vector<8xf32> to vector<8x1xf32>
    %cst_8 = arith.constant 3.200000e+01 : f32
    %13 = vector.broadcast %cst_8 : f32 to vector<8x1xf32>
    %14 = arith.divf %12, %13 : vector<8x1xf32>
    %15 = vector.broadcast %7 : vector<8x1xf32> to vector<8x32xf32>
    %16 = arith.subf %1, %15 : vector<8x32xf32>
    %cst_9 = arith.constant 9.99999974E-6 : f32
    %17 = vector.broadcast %cst_9 : f32 to vector<8x1xf32>
    %18 = arith.addf %14, %17 : vector<8x1xf32>
    %19 = math.rsqrt %18 : vector<8x1xf32>
    %20 = vector.broadcast %19 : vector<8x1xf32> to vector<8x32xf32>
    %21 = arith.mulf %16, %20 : vector<8x32xf32>
    %22 = vector.broadcast %2 : vector<1x32xf32> to vector<8x32xf32>
    %23 = arith.mulf %21, %22 : vector<8x32xf32>
    %24 = vector.broadcast %3 : vector<1x32xf32> to vector<8x32xf32>
    %25 = arith.addf %23, %24 : vector<8x32xf32>
    %c0_10 = arith.constant 0 : index
    %c0_11 = arith.constant 0 : index
    %26 = vector.load %arg5[%c0_10, %c0_11] : memref<32x96xf32, #tpu.memory_space<vmem>>, vector<32x96xf32>
    %cst_12 = arith.constant dense<0.000000e+00> : vector<8x96xf32>
    %27 = tpu.matmul %25, %26, %cst_12 {dimension_numbers = #tpu.dot_dimension_numbers<[1], [0], [0], [1], [0, 0, 1, 1], [], []>} : vector<8x32xf32>, vector<32x96xf32>, vector<8x96xf32> -> vector<8x96xf32>
    %c0_13 = arith.constant 0 : index
    %c0_14 = arith.constant 0 : index
    %28 = vector.load %arg6[%c0_13, %c0_14] : memref<1x96xf32, #tpu.memory_space<vmem>>, vector<1x96xf32>
    %29 = vector.broadcast %28 : vector<1x96xf32> to vector<8x96xf32>
    %30 = arith.addf %27, %29 : vector<8x96xf32>
    %c0_15 = arith.constant 0 : index
    %c0_16 = arith.constant 0 : index
    %c0_17 = arith.constant 0 : index
    %31 = vector.load %arg7[%c0_15, %c0_16, %c0_17] : memref<1x8x96xf32, #tpu.memory_space<vmem>>, vector<1x8x96xf32>
    %32 = vector.shape_cast %31 : vector<1x8x96xf32> to vector<8x96xf32>
    %33 = vector.shape_cast %30 : vector<8x96xf32> to vector<1x8x96xf32>
    tpu.vector_store %arg7[%c0_15, %c0_16, %c0_17], %33 {strides = array<i32>} : memref<1x8x96xf32, #tpu.memory_space<vmem>>, vector<1x8x96xf32>,
    return
  }
  func.func @transform_0(%arg0: i32, %arg1: i32) -> (i32, i32, i32) {
    %c0_i32 = arith.constant 0 : i32
    %c0_i32_0 = arith.constant 0 : i32
    %c0_i32_1 = arith.constant 0 : i32
    return %arg0, %c0_i32, %c0_i32_0 : i32, i32, i32
  }
  func.func @transform_1(%arg0: i32, %arg1: i32) -> (i32, i32) {
    %c0_i32 = arith.constant 0 : i32
    %c0_i32_0 = arith.constant 0 : i32
    %c0_i32_1 = arith.constant 0 : i32
    return %c0_i32, %c0_i32_0 : i32, i32
  }
  func.func @transform_2(%arg0: i32, %arg1: i32) -> (i32, i32) {
    %c0_i32 = arith.constant 0 : i32
    %c0_i32_0 = arith.constant 0 : i32
    %c0_i32_1 = arith.constant 0 : i32
    return %c0_i32, %c0_i32_0 : i32, i32
  }
  func.func @transform_3(%arg0: i32, %arg1: i32) -> (i32, i32) {
    %c0_i32 = arith.constant 0 : i32
    %c0_i32_0 = arith.constant 0 : i32
    return %c0_i32, %arg1 : i32, i32
  }
  func.func @transform_4(%arg0: i32, %arg1: i32) -> (i32, i32) {
    %c0_i32 = arith.constant 0 : i32
    %c0_i32_0 = arith.constant 0 : i32
    return %c0_i32, %arg1 : i32, i32
  }
  func.func @transform_5(%arg0: i32, %arg1: i32) -> (i32, i32, i32) {
    %c0_i32 = arith.constant 0 : i32
    %c0_i32_0 = arith.constant 0 : i32
    return %arg0, %c0_i32, %arg1 : i32, i32, i32
  }
}

module attributes {stable_mosaic.version = 11 : i64} {
  func.func @_attention_kernel(%arg0: i32, %arg1: memref<1x8x96xf32, #tpu.memory_space<vmem>>, %arg2: memref<8x8xf32, #tpu.memory_space<vmem>>, %arg3: memref<1x8x32xf32, #tpu.memory_space<vmem>>) attributes {dimension_semantics = [#tpu.dimension_semantics<parallel>], iteration_bounds = array<i64: 2>, scalar_prefetch = 0 : i64, scratch_operands = 0 : i64, tpu.core_type = #tpu.core_type<tc>, window_params = [{transform_indices = @transform_0, window_bounds = array<i64: 1, 8, 96>}, {pipeline_mode = #tpu.pipeline_mode<synchronous>, transform_indices = @transform_1, window_bounds = array<i64: 8, 8>}, {transform_indices = @transform_2, window_bounds = array<i64: 1, 8, 32>}]} {
    %c0 = arith.constant 0 : index
    %c0_0 = arith.constant 0 : index
    %c0_1 = arith.constant 0 : index
    %0 = vector.load %arg1[%c0, %c0_0, %c0_1] : memref<1x8x96xf32, #tpu.memory_space<vmem>>, vector<1x8x96xf32>
    %1 = vector.shape_cast %0 : vector<1x8x96xf32> to vector<8x96xf32>
    %c0_2 = arith.constant 0 : index
    %c0_3 = arith.constant 0 : index
    %2 = vector.load %arg2[%c0_2, %c0_3] : memref<8x8xf32, #tpu.memory_space<vmem>>, vector<8x8xf32>
    %3 = vector.extract_strided_slice %1 {offsets = [0, 0], sizes = [8, 8], strides = [1, 1]} : vector<8x96xf32> to vector<8x8xf32>
    %4 = vector.extract_strided_slice %1 {offsets = [0, 32], sizes = [8, 8], strides = [1, 1]} : vector<8x96xf32> to vector<8x8xf32>
    %5 = vector.extract_strided_slice %1 {offsets = [0, 64], sizes = [8, 8], strides = [1, 1]} : vector<8x96xf32> to vector<8x8xf32>
    %cst = arith.constant dense<0.000000e+00> : vector<8x8xf32>
    %6 = tpu.matmul %3, %4, %cst {dimension_numbers = #tpu.dot_dimension_numbers<[1], [1], [0], [0], [0, 0, 1, 0], [], []>} : vector<8x8xf32>, vector<8x8xf32>, vector<8x8xf32> -> vector<8x8xf32>
    %cst_4 = arith.constant 0.353553385 : f32
    %7 = vector.broadcast %cst_4 : f32 to vector<8x8xf32>
    %8 = arith.mulf %6, %7 : vector<8x8xf32>
    %9 = arith.addf %8, %2 : vector<8x8xf32>
    %cst_5 = arith.constant dense<0xFF800000> : vector<8xf32>
    %10 = vector.multi_reduction <maximumf>, %9, %cst_5 [1] : vector<8x8xf32> to vector<8xf32>
    %11 = vector.shape_cast %10 : vector<8xf32> to vector<8x1xf32>
    %12 = vector.broadcast %11 : vector<8x1xf32> to vector<8x8xf32>
    %13 = arith.subf %9, %12 : vector<8x8xf32>
    %14 = math.exp %13 : vector<8x8xf32>
    %cst_6 = arith.constant dense<0.000000e+00> : vector<8xf32>
    %15 = vector.multi_reduction <add>, %14, %cst_6 [1] : vector<8x8xf32> to vector<8xf32>
    %16 = vector.shape_cast %15 : vector<8xf32> to vector<8x1xf32>
    %17 = tpu.reciprocal %16 : vector<8x1xf32> -> vector<8x1xf32>
    %18 = vector.broadcast %17 : vector<8x1xf32> to vector<8x8xf32>
    %19 = arith.mulf %14, %18 : vector<8x8xf32>
    %cst_7 = arith.constant dense<0.000000e+00> : vector<8x8xf32>
    %20 = tpu.matmul %19, %5, %cst_7 {dimension_numbers = #tpu.dot_dimension_numbers<[1], [0], [0], [1], [0, 0, 1, 1], [], []>} : vector<8x8xf32>, vector<8x8xf32>, vector<8x8xf32> -> vector<8x8xf32>
    %21 = vector.extract_strided_slice %1 {offsets = [0, 8], sizes = [8, 8], strides = [1, 1]} : vector<8x96xf32> to vector<8x8xf32>
    %22 = vector.extract_strided_slice %1 {offsets = [0, 40], sizes = [8, 8], strides = [1, 1]} : vector<8x96xf32> to vector<8x8xf32>
    %23 = vector.extract_strided_slice %1 {offsets = [0, 72], sizes = [8, 8], strides = [1, 1]} : vector<8x96xf32> to vector<8x8xf32>
    %cst_8 = arith.constant dense<0.000000e+00> : vector<8x8xf32>
    %24 = tpu.matmul %21, %22, %cst_8 {dimension_numbers = #tpu.dot_dimension_numbers<[1], [1], [0], [0], [0, 0, 1, 0], [], []>} : vector<8x8xf32>, vector<8x8xf32>, vector<8x8xf32> -> vector<8x8xf32>
    %cst_9 = arith.constant 0.353553385 : f32
    %25 = vector.broadcast %cst_9 : f32 to vector<8x8xf32>
    %26 = arith.mulf %24, %25 : vector<8x8xf32>
    %27 = arith.addf %26, %2 : vector<8x8xf32>
    %cst_10 = arith.constant dense<0xFF800000> : vector<8xf32>
    %28 = vector.multi_reduction <maximumf>, %27, %cst_10 [1] : vector<8x8xf32> to vector<8xf32>
    %29 = vector.shape_cast %28 : vector<8xf32> to vector<8x1xf32>
    %30 = vector.broadcast %29 : vector<8x1xf32> to vector<8x8xf32>
    %31 = arith.subf %27, %30 : vector<8x8xf32>
    %32 = math.exp %31 : vector<8x8xf32>
    %cst_11 = arith.constant dense<0.000000e+00> : vector<8xf32>
    %33 = vector.multi_reduction <add>, %32, %cst_11 [1] : vector<8x8xf32> to vector<8xf32>
    %34 = vector.shape_cast %33 : vector<8xf32> to vector<8x1xf32>
    %35 = tpu.reciprocal %34 : vector<8x1xf32> -> vector<8x1xf32>
    %36 = vector.broadcast %35 : vector<8x1xf32> to vector<8x8xf32>
    %37 = arith.mulf %32, %36 : vector<8x8xf32>
    %cst_12 = arith.constant dense<0.000000e+00> : vector<8x8xf32>
    %38 = tpu.matmul %37, %23, %cst_12 {dimension_numbers = #tpu.dot_dimension_numbers<[1], [0], [0], [1], [0, 0, 1, 1], [], []>} : vector<8x8xf32>, vector<8x8xf32>, vector<8x8xf32> -> vector<8x8xf32>
    %39 = vector.extract_strided_slice %1 {offsets = [0, 16], sizes = [8, 8], strides = [1, 1]} : vector<8x96xf32> to vector<8x8xf32>
    %40 = vector.extract_strided_slice %1 {offsets = [0, 48], sizes = [8, 8], strides = [1, 1]} : vector<8x96xf32> to vector<8x8xf32>
    %41 = vector.extract_strided_slice %1 {offsets = [0, 80], sizes = [8, 8], strides = [1, 1]} : vector<8x96xf32> to vector<8x8xf32>
    %cst_13 = arith.constant dense<0.000000e+00> : vector<8x8xf32>
    %42 = tpu.matmul %39, %40, %cst_13 {dimension_numbers = #tpu.dot_dimension_numbers<[1], [1], [0], [0], [0, 0, 1, 0], [], []>} : vector<8x8xf32>, vector<8x8xf32>, vector<8x8xf32> -> vector<8x8xf32>
    %cst_14 = arith.constant 0.353553385 : f32
    %43 = vector.broadcast %cst_14 : f32 to vector<8x8xf32>
    %44 = arith.mulf %42, %43 : vector<8x8xf32>
    %45 = arith.addf %44, %2 : vector<8x8xf32>
    %cst_15 = arith.constant dense<0xFF800000> : vector<8xf32>
    %46 = vector.multi_reduction <maximumf>, %45, %cst_15 [1] : vector<8x8xf32> to vector<8xf32>
    %47 = vector.shape_cast %46 : vector<8xf32> to vector<8x1xf32>
    %48 = vector.broadcast %47 : vector<8x1xf32> to vector<8x8xf32>
    %49 = arith.subf %45, %48 : vector<8x8xf32>
    %50 = math.exp %49 : vector<8x8xf32>
    %cst_16 = arith.constant dense<0.000000e+00> : vector<8xf32>
    %51 = vector.multi_reduction <add>, %50, %cst_16 [1] : vector<8x8xf32> to vector<8xf32>
    %52 = vector.shape_cast %51 : vector<8xf32> to vector<8x1xf32>
    %53 = tpu.reciprocal %52 : vector<8x1xf32> -> vector<8x1xf32>
    %54 = vector.broadcast %53 : vector<8x1xf32> to vector<8x8xf32>
    %55 = arith.mulf %50, %54 : vector<8x8xf32>
    %cst_17 = arith.constant dense<0.000000e+00> : vector<8x8xf32>
    %56 = tpu.matmul %55, %41, %cst_17 {dimension_numbers = #tpu.dot_dimension_numbers<[1], [0], [0], [1], [0, 0, 1, 1], [], []>} : vector<8x8xf32>, vector<8x8xf32>, vector<8x8xf32> -> vector<8x8xf32>
    %57 = vector.extract_strided_slice %1 {offsets = [0, 24], sizes = [8, 8], strides = [1, 1]} : vector<8x96xf32> to vector<8x8xf32>
    %58 = vector.extract_strided_slice %1 {offsets = [0, 56], sizes = [8, 8], strides = [1, 1]} : vector<8x96xf32> to vector<8x8xf32>
    %59 = vector.extract_strided_slice %1 {offsets = [0, 88], sizes = [8, 8], strides = [1, 1]} : vector<8x96xf32> to vector<8x8xf32>
    %cst_18 = arith.constant dense<0.000000e+00> : vector<8x8xf32>
    %60 = tpu.matmul %57, %58, %cst_18 {dimension_numbers = #tpu.dot_dimension_numbers<[1], [1], [0], [0], [0, 0, 1, 0], [], []>} : vector<8x8xf32>, vector<8x8xf32>, vector<8x8xf32> -> vector<8x8xf32>
    %cst_19 = arith.constant 0.353553385 : f32
    %61 = vector.broadcast %cst_19 : f32 to vector<8x8xf32>
    %62 = arith.mulf %60, %61 : vector<8x8xf32>
    %63 = arith.addf %62, %2 : vector<8x8xf32>
    %cst_20 = arith.constant dense<0xFF800000> : vector<8xf32>
    %64 = vector.multi_reduction <maximumf>, %63, %cst_20 [1] : vector<8x8xf32> to vector<8xf32>
    %65 = vector.shape_cast %64 : vector<8xf32> to vector<8x1xf32>
    %66 = vector.broadcast %65 : vector<8x1xf32> to vector<8x8xf32>
    %67 = arith.subf %63, %66 : vector<8x8xf32>
    %68 = math.exp %67 : vector<8x8xf32>
    %cst_21 = arith.constant dense<0.000000e+00> : vector<8xf32>
    %69 = vector.multi_reduction <add>, %68, %cst_21 [1] : vector<8x8xf32> to vector<8xf32>
    %70 = vector.shape_cast %69 : vector<8xf32> to vector<8x1xf32>
    %71 = tpu.reciprocal %70 : vector<8x1xf32> -> vector<8x1xf32>
    %72 = vector.broadcast %71 : vector<8x1xf32> to vector<8x8xf32>
    %73 = arith.mulf %68, %72 : vector<8x8xf32>
    %cst_22 = arith.constant dense<0.000000e+00> : vector<8x8xf32>
    %74 = tpu.matmul %73, %59, %cst_22 {dimension_numbers = #tpu.dot_dimension_numbers<[1], [0], [0], [1], [0, 0, 1, 1], [], []>} : vector<8x8xf32>, vector<8x8xf32>, vector<8x8xf32> -> vector<8x8xf32>
    %75 = tpu.concatenate %20, %38, %56, %74 in 1 : vector<8x8xf32>, vector<8x8xf32>, vector<8x8xf32>, vector<8x8xf32> -> vector<8x32xf32>
    %c0_23 = arith.constant 0 : index
    %c0_24 = arith.constant 0 : index
    %c0_25 = arith.constant 0 : index
    %76 = vector.load %arg3[%c0_23, %c0_24, %c0_25] : memref<1x8x32xf32, #tpu.memory_space<vmem>>, vector<1x8x32xf32>
    %77 = vector.shape_cast %76 : vector<1x8x32xf32> to vector<8x32xf32>
    %78 = vector.shape_cast %75 : vector<8x32xf32> to vector<1x8x32xf32>
    tpu.vector_store %arg3[%c0_23, %c0_24, %c0_25], %78 {strides = array<i32>} : memref<1x8x32xf32, #tpu.memory_space<vmem>>, vector<1x8x32xf32>,
    return
  }
  func.func @transform_0(%arg0: i32) -> (i32, i32, i32) {
    %c0_i32 = arith.constant 0 : i32
    %c0_i32_0 = arith.constant 0 : i32
    %c0_i32_1 = arith.constant 0 : i32
    return %arg0, %c0_i32, %c0_i32_0 : i32, i32, i32
  }
  func.func @transform_1(%arg0: i32) -> (i32, i32) {
    %c0_i32 = arith.constant 0 : i32
    %c0_i32_0 = arith.constant 0 : i32
    %c0_i32_1 = arith.constant 0 : i32
    return %c0_i32, %c0_i32_0 : i32, i32
  }
  func.func @transform_2(%arg0: i32) -> (i32, i32, i32) {
    %c0_i32 = arith.constant 0 : i32
    %c0_i32_0 = arith.constant 0 : i32
    %c0_i32_1 = arith.constant 0 : i32
    return %arg0, %c0_i32, %c0_i32_0 : i32, i32, i32
  }
}

module attributes {stable_mosaic.version = 11 : i64} {
  func.func @_linear_residual_kernel(%arg0: i32, %arg1: i32, %arg2: memref<1x8x32xf32, #tpu.memory_space<vmem>>, %arg3: memref<32x32xf32, #tpu.memory_space<vmem>>, %arg4: memref<1x32xf32, #tpu.memory_space<vmem>>, %arg5: memref<1x8x32xf32, #tpu.memory_space<vmem>>, %arg6: memref<1x8x32xf32, #tpu.memory_space<vmem>>) attributes {dimension_semantics = [#tpu.dimension_semantics<parallel>, #tpu.dimension_semantics<parallel>], iteration_bounds = array<i64: 2, 1>, scalar_prefetch = 0 : i64, scratch_operands = 0 : i64, tpu.core_type = #tpu.core_type<tc>, window_params = [{transform_indices = @transform_0, window_bounds = array<i64: 1, 8, 32>}, {transform_indices = @transform_1, window_bounds = array<i64: 32, 32>}, {transform_indices = @transform_2, window_bounds = array<i64: 1, 32>}, {transform_indices = @transform_3, window_bounds = array<i64: 1, 8, 32>}, {transform_indices = @transform_4, window_bounds = array<i64: 1, 8, 32>}]} {
    %c0 = arith.constant 0 : index
    %c0_0 = arith.constant 0 : index
    %c0_1 = arith.constant 0 : index
    %0 = vector.load %arg2[%c0, %c0_0, %c0_1] : memref<1x8x32xf32, #tpu.memory_space<vmem>>, vector<1x8x32xf32>
    %1 = vector.shape_cast %0 : vector<1x8x32xf32> to vector<8x32xf32>
    %c0_2 = arith.constant 0 : index
    %c0_3 = arith.constant 0 : index
    %2 = vector.load %arg3[%c0_2, %c0_3] : memref<32x32xf32, #tpu.memory_space<vmem>>, vector<32x32xf32>
    %cst = arith.constant dense<0.000000e+00> : vector<8x32xf32>
    %3 = tpu.matmul %1, %2, %cst {dimension_numbers = #tpu.dot_dimension_numbers<[1], [0], [0], [1], [0, 0, 1, 1], [], []>} : vector<8x32xf32>, vector<32x32xf32>, vector<8x32xf32> -> vector<8x32xf32>
    %c0_4 = arith.constant 0 : index
    %c0_5 = arith.constant 0 : index
    %4 = vector.load %arg4[%c0_4, %c0_5] : memref<1x32xf32, #tpu.memory_space<vmem>>, vector<1x32xf32>
    %5 = vector.broadcast %4 : vector<1x32xf32> to vector<8x32xf32>
    %6 = arith.addf %3, %5 : vector<8x32xf32>
    %c0_6 = arith.constant 0 : index
    %c0_7 = arith.constant 0 : index
    %c0_8 = arith.constant 0 : index
    %7 = vector.load %arg5[%c0_6, %c0_7, %c0_8] : memref<1x8x32xf32, #tpu.memory_space<vmem>>, vector<1x8x32xf32>
    %8 = vector.shape_cast %7 : vector<1x8x32xf32> to vector<8x32xf32>
    %9 = arith.addf %6, %8 : vector<8x32xf32>
    %c0_9 = arith.constant 0 : index
    %c0_10 = arith.constant 0 : index
    %c0_11 = arith.constant 0 : index
    %10 = vector.load %arg6[%c0_9, %c0_10, %c0_11] : memref<1x8x32xf32, #tpu.memory_space<vmem>>, vector<1x8x32xf32>
    %11 = vector.shape_cast %10 : vector<1x8x32xf32> to vector<8x32xf32>
    %12 = vector.shape_cast %9 : vector<8x32xf32> to vector<1x8x32xf32>
    tpu.vector_store %arg6[%c0_9, %c0_10, %c0_11], %12 {strides = array<i32>} : memref<1x8x32xf32, #tpu.memory_space<vmem>>, vector<1x8x32xf32>,
    return
  }
  func.func @transform_0(%arg0: i32, %arg1: i32) -> (i32, i32, i32) {
    %c0_i32 = arith.constant 0 : i32
    %c0_i32_0 = arith.constant 0 : i32
    %c0_i32_1 = arith.constant 0 : i32
    return %arg0, %c0_i32, %c0_i32_0 : i32, i32, i32
  }
  func.func @transform_1(%arg0: i32, %arg1: i32) -> (i32, i32) {
    %c0_i32 = arith.constant 0 : i32
    %c0_i32_0 = arith.constant 0 : i32
    return %c0_i32, %arg1 : i32, i32
  }
  func.func @transform_2(%arg0: i32, %arg1: i32) -> (i32, i32) {
    %c0_i32 = arith.constant 0 : i32
    %c0_i32_0 = arith.constant 0 : i32
    return %c0_i32, %arg1 : i32, i32
  }
  func.func @transform_3(%arg0: i32, %arg1: i32) -> (i32, i32, i32) {
    %c0_i32 = arith.constant 0 : i32
    %c0_i32_0 = arith.constant 0 : i32
    return %arg0, %c0_i32, %arg1 : i32, i32, i32
  }
  func.func @transform_4(%arg0: i32, %arg1: i32) -> (i32, i32, i32) {
    %c0_i32 = arith.constant 0 : i32
    %c0_i32_0 = arith.constant 0 : i32
    return %arg0, %c0_i32, %arg1 : i32, i32, i32
  }
}

module attributes {stable_mosaic.version = 11 : i64} {
  func.func @_ln_linear_kernel(%arg0: i32, %arg1: i32, %arg2: memref<1x8x32xf32, #tpu.memory_space<vmem>>, %arg3: memref<1x32xf32, #tpu.memory_space<vmem>>, %arg4: memref<1x32xf32, #tpu.memory_space<vmem>>, %arg5: memref<32x96xf32, #tpu.memory_space<vmem>>, %arg6: memref<1x96xf32, #tpu.memory_space<vmem>>, %arg7: memref<1x8x96xf32, #tpu.memory_space<vmem>>) attributes {dimension_semantics = [#tpu.dimension_semantics<parallel>, #tpu.dimension_semantics<parallel>], iteration_bounds = array<i64: 2, 1>, scalar_prefetch = 0 : i64, scratch_operands = 0 : i64, tpu.core_type = #tpu.core_type<tc>, window_params = [{transform_indices = @transform_0, window_bounds = array<i64: 1, 8, 32>}, {pipeline_mode = #tpu.pipeline_mode<synchronous>, transform_indices = @transform_1, window_bounds = array<i64: 1, 32>}, {pipeline_mode = #tpu.pipeline_mode<synchronous>, transform_indices = @transform_2, window_bounds = array<i64: 1, 32>}, {transform_indices = @transform_3, window_bounds = array<i64: 32, 96>}, {transform_indices = @transform_4, window_bounds = array<i64: 1, 96>}, {transform_indices = @transform_5, window_bounds = array<i64: 1, 8, 96>}]} {
    %c0 = arith.constant 0 : index
    %c0_0 = arith.constant 0 : index
    %c0_1 = arith.constant 0 : index
    %0 = vector.load %arg2[%c0, %c0_0, %c0_1] : memref<1x8x32xf32, #tpu.memory_space<vmem>>, vector<1x8x32xf32>
    %1 = vector.shape_cast %0 : vector<1x8x32xf32> to vector<8x32xf32>
    %c0_2 = arith.constant 0 : index
    %c0_3 = arith.constant 0 : index
    %2 = vector.load %arg3[%c0_2, %c0_3] : memref<1x32xf32, #tpu.memory_space<vmem>>, vector<1x32xf32>
    %c0_4 = arith.constant 0 : index
    %c0_5 = arith.constant 0 : index
    %3 = vector.load %arg4[%c0_4, %c0_5] : memref<1x32xf32, #tpu.memory_space<vmem>>, vector<1x32xf32>
    %cst = arith.constant dense<0.000000e+00> : vector<8xf32>
    %4 = vector.multi_reduction <add>, %1, %cst [1] : vector<8x32xf32> to vector<8xf32>
    %5 = vector.shape_cast %4 : vector<8xf32> to vector<8x1xf32>
    %cst_6 = arith.constant 3.200000e+01 : f32
    %6 = vector.broadcast %cst_6 : f32 to vector<8x1xf32>
    %7 = arith.divf %5, %6 : vector<8x1xf32>
    %8 = vector.broadcast %7 : vector<8x1xf32> to vector<8x32xf32>
    %9 = arith.subf %1, %8 : vector<8x32xf32>
    %10 = arith.mulf %9, %9 : vector<8x32xf32>
    %cst_7 = arith.constant dense<0.000000e+00> : vector<8xf32>
    %11 = vector.multi_reduction <add>, %10, %cst_7 [1] : vector<8x32xf32> to vector<8xf32>
    %12 = vector.shape_cast %11 : vector<8xf32> to vector<8x1xf32>
    %cst_8 = arith.constant 3.200000e+01 : f32
    %13 = vector.broadcast %cst_8 : f32 to vector<8x1xf32>
    %14 = arith.divf %12, %13 : vector<8x1xf32>
    %15 = vector.broadcast %7 : vector<8x1xf32> to vector<8x32xf32>
    %16 = arith.subf %1, %15 : vector<8x32xf32>
    %cst_9 = arith.constant 9.99999974E-6 : f32
    %17 = vector.broadcast %cst_9 : f32 to vector<8x1xf32>
    %18 = arith.addf %14, %17 : vector<8x1xf32>
    %19 = math.rsqrt %18 : vector<8x1xf32>
    %20 = vector.broadcast %19 : vector<8x1xf32> to vector<8x32xf32>
    %21 = arith.mulf %16, %20 : vector<8x32xf32>
    %22 = vector.broadcast %2 : vector<1x32xf32> to vector<8x32xf32>
    %23 = arith.mulf %21, %22 : vector<8x32xf32>
    %24 = vector.broadcast %3 : vector<1x32xf32> to vector<8x32xf32>
    %25 = arith.addf %23, %24 : vector<8x32xf32>
    %c0_10 = arith.constant 0 : index
    %c0_11 = arith.constant 0 : index
    %26 = vector.load %arg5[%c0_10, %c0_11] : memref<32x96xf32, #tpu.memory_space<vmem>>, vector<32x96xf32>
    %cst_12 = arith.constant dense<0.000000e+00> : vector<8x96xf32>
    %27 = tpu.matmul %25, %26, %cst_12 {dimension_numbers = #tpu.dot_dimension_numbers<[1], [0], [0], [1], [0, 0, 1, 1], [], []>} : vector<8x32xf32>, vector<32x96xf32>, vector<8x96xf32> -> vector<8x96xf32>
    %c0_13 = arith.constant 0 : index
    %c0_14 = arith.constant 0 : index
    %28 = vector.load %arg6[%c0_13, %c0_14] : memref<1x96xf32, #tpu.memory_space<vmem>>, vector<1x96xf32>
    %29 = vector.broadcast %28 : vector<1x96xf32> to vector<8x96xf32>
    %30 = arith.addf %27, %29 : vector<8x96xf32>
    %c0_15 = arith.constant 0 : index
    %c0_16 = arith.constant 0 : index
    %c0_17 = arith.constant 0 : index
    %31 = vector.load %arg7[%c0_15, %c0_16, %c0_17] : memref<1x8x96xf32, #tpu.memory_space<vmem>>, vector<1x8x96xf32>
    %32 = vector.shape_cast %31 : vector<1x8x96xf32> to vector<8x96xf32>
    %33 = vector.shape_cast %30 : vector<8x96xf32> to vector<1x8x96xf32>
    tpu.vector_store %arg7[%c0_15, %c0_16, %c0_17], %33 {strides = array<i32>} : memref<1x8x96xf32, #tpu.memory_space<vmem>>, vector<1x8x96xf32>,
    return
  }
  func.func @transform_0(%arg0: i32, %arg1: i32) -> (i32, i32, i32) {
    %c0_i32 = arith.constant 0 : i32
    %c0_i32_0 = arith.constant 0 : i32
    %c0_i32_1 = arith.constant 0 : i32
    return %arg0, %c0_i32, %c0_i32_0 : i32, i32, i32
  }
  func.func @transform_1(%arg0: i32, %arg1: i32) -> (i32, i32) {
    %c0_i32 = arith.constant 0 : i32
    %c0_i32_0 = arith.constant 0 : i32
    %c0_i32_1 = arith.constant 0 : i32
    return %c0_i32, %c0_i32_0 : i32, i32
  }
  func.func @transform_2(%arg0: i32, %arg1: i32) -> (i32, i32) {
    %c0_i32 = arith.constant 0 : i32
    %c0_i32_0 = arith.constant 0 : i32
    %c0_i32_1 = arith.constant 0 : i32
    return %c0_i32, %c0_i32_0 : i32, i32
  }
  func.func @transform_3(%arg0: i32, %arg1: i32) -> (i32, i32) {
    %c0_i32 = arith.constant 0 : i32
    %c0_i32_0 = arith.constant 0 : i32
    return %c0_i32, %arg1 : i32, i32
  }
  func.func @transform_4(%arg0: i32, %arg1: i32) -> (i32, i32) {
    %c0_i32 = arith.constant 0 : i32
    %c0_i32_0 = arith.constant 0 : i32
    return %c0_i32, %arg1 : i32, i32
  }
  func.func @transform_5(%arg0: i32, %arg1: i32) -> (i32, i32, i32) {
    %c0_i32 = arith.constant 0 : i32
    %c0_i32_0 = arith.constant 0 : i32
    return %arg0, %c0_i32, %arg1 : i32, i32, i32
  }
}

module attributes {stable_mosaic.version = 11 : i64} {
  func.func @_linear_residual_kernel(%arg0: i32, %arg1: i32, %arg2: memref<1x8x32xf32, #tpu.memory_space<vmem>>, %arg3: memref<32x32xf32, #tpu.memory_space<vmem>>, %arg4: memref<1x32xf32, #tpu.memory_space<vmem>>, %arg5: memref<1x8x32xf32, #tpu.memory_space<vmem>>, %arg6: memref<1x8x32xf32, #tpu.memory_space<vmem>>) attributes {dimension_semantics = [#tpu.dimension_semantics<parallel>, #tpu.dimension_semantics<parallel>], iteration_bounds = array<i64: 2, 1>, scalar_prefetch = 0 : i64, scratch_operands = 0 : i64, tpu.core_type = #tpu.core_type<tc>, window_params = [{transform_indices = @transform_0, window_bounds = array<i64: 1, 8, 32>}, {transform_indices = @transform_1, window_bounds = array<i64: 32, 32>}, {transform_indices = @transform_2, window_bounds = array<i64: 1, 32>}, {transform_indices = @transform_3, window_bounds = array<i64: 1, 8, 32>}, {transform_indices = @transform_4, window_bounds = array<i64: 1, 8, 32>}]} {
    %c0 = arith.constant 0 : index
    %c0_0 = arith.constant 0 : index
    %c0_1 = arith.constant 0 : index
    %0 = vector.load %arg2[%c0, %c0_0, %c0_1] : memref<1x8x32xf32, #tpu.memory_space<vmem>>, vector<1x8x32xf32>
    %1 = vector.shape_cast %0 : vector<1x8x32xf32> to vector<8x32xf32>
    %c0_2 = arith.constant 0 : index
    %c0_3 = arith.constant 0 : index
    %2 = vector.load %arg3[%c0_2, %c0_3] : memref<32x32xf32, #tpu.memory_space<vmem>>, vector<32x32xf32>
    %cst = arith.constant dense<0.000000e+00> : vector<8x32xf32>
    %3 = tpu.matmul %1, %2, %cst {dimension_numbers = #tpu.dot_dimension_numbers<[1], [0], [0], [1], [0, 0, 1, 1], [], []>} : vector<8x32xf32>, vector<32x32xf32>, vector<8x32xf32> -> vector<8x32xf32>
    %c0_4 = arith.constant 0 : index
    %c0_5 = arith.constant 0 : index
    %4 = vector.load %arg4[%c0_4, %c0_5] : memref<1x32xf32, #tpu.memory_space<vmem>>, vector<1x32xf32>
    %5 = vector.broadcast %4 : vector<1x32xf32> to vector<8x32xf32>
    %6 = arith.addf %3, %5 : vector<8x32xf32>
    %c0_6 = arith.constant 0 : index
    %c0_7 = arith.constant 0 : index
    %c0_8 = arith.constant 0 : index
    %7 = vector.load %arg5[%c0_6, %c0_7, %c0_8] : memref<1x8x32xf32, #tpu.memory_space<vmem>>, vector<1x8x32xf32>
    %8 = vector.shape_cast %7 : vector<1x8x32xf32> to vector<8x32xf32>
    %9 = arith.addf %6, %8 : vector<8x32xf32>
    %c0_9 = arith.constant 0 : index
    %c0_10 = arith.constant 0 : index
    %c0_11 = arith.constant 0 : index
    %10 = vector.load %arg6[%c0_9, %c0_10, %c0_11] : memref<1x8x32xf32, #tpu.memory_space<vmem>>, vector<1x8x32xf32>
    %11 = vector.shape_cast %10 : vector<1x8x32xf32> to vector<8x32xf32>
    %12 = vector.shape_cast %9 : vector<8x32xf32> to vector<1x8x32xf32>
    tpu.vector_store %arg6[%c0_9, %c0_10, %c0_11], %12 {strides = array<i32>} : memref<1x8x32xf32, #tpu.memory_space<vmem>>, vector<1x8x32xf32>,
    return
  }
  func.func @transform_0(%arg0: i32, %arg1: i32) -> (i32, i32, i32) {
    %c0_i32 = arith.constant 0 : i32
    %c0_i32_0 = arith.constant 0 : i32
    %c0_i32_1 = arith.constant 0 : i32
    return %arg0, %c0_i32, %c0_i32_0 : i32, i32, i32
  }
  func.func @transform_1(%arg0: i32, %arg1: i32) -> (i32, i32) {
    %c0_i32 = arith.constant 0 : i32
    %c0_i32_0 = arith.constant 0 : i32
    return %c0_i32, %arg1 : i32, i32
  }
  func.func @transform_2(%arg0: i32, %arg1: i32) -> (i32, i32) {
    %c0_i32 = arith.constant 0 : i32
    %c0_i32_0 = arith.constant 0 : i32
    return %c0_i32, %arg1 : i32, i32
  }
  func.func @transform_3(%arg0: i32, %arg1: i32) -> (i32, i32, i32) {
    %c0_i32 = arith.constant 0 : i32
    %c0_i32_0 = arith.constant 0 : i32
    return %arg0, %c0_i32, %arg1 : i32, i32, i32
  }
  func.func @transform_4(%arg0: i32, %arg1: i32) -> (i32, i32, i32) {
    %c0_i32 = arith.constant 0 : i32
    %c0_i32_0 = arith.constant 0 : i32
    return %arg0, %c0_i32, %arg1 : i32, i32, i32
  }
}

module attributes {stable_mosaic.version = 11 : i64} {
  func.func @_mlp_kernel(%arg0: i32, %arg1: memref<1x8x32xf32, #tpu.memory_space<vmem>>, %arg2: memref<1x32xf32, #tpu.memory_space<vmem>>, %arg3: memref<1x32xf32, #tpu.memory_space<vmem>>, %arg4: memref<32x128xf32, #tpu.memory_space<vmem>>, %arg5: memref<1x128xf32, #tpu.memory_space<vmem>>, %arg6: memref<128x32xf32, #tpu.memory_space<vmem>>, %arg7: memref<1x32xf32, #tpu.memory_space<vmem>>, %arg8: memref<1x8x32xf32, #tpu.memory_space<vmem>>) attributes {dimension_semantics = [#tpu.dimension_semantics<parallel>], iteration_bounds = array<i64: 2>, scalar_prefetch = 0 : i64, scratch_operands = 0 : i64, tpu.core_type = #tpu.core_type<tc>, window_params = [{transform_indices = @transform_0, window_bounds = array<i64: 1, 8, 32>}, {pipeline_mode = #tpu.pipeline_mode<synchronous>, transform_indices = @transform_1, window_bounds = array<i64: 1, 32>}, {pipeline_mode = #tpu.pipeline_mode<synchronous>, transform_indices = @transform_2, window_bounds = array<i64: 1, 32>}, {pipeline_mode = #tpu.pipeline_mode<synchronous>, transform_indices = @transform_3, window_bounds = array<i64: 32, 128>}, {pipeline_mode = #tpu.pipeline_mode<synchronous>, transform_indices = @transform_4, window_bounds = array<i64: 1, 128>}, {pipeline_mode = #tpu.pipeline_mode<synchronous>, transform_indices = @transform_5, window_bounds = array<i64: 128, 32>}, {pipeline_mode = #tpu.pipeline_mode<synchronous>, transform_indices = @transform_6, window_bounds = array<i64: 1, 32>}, {transform_indices = @transform_7, window_bounds = array<i64: 1, 8, 32>}]} {
    %c0 = arith.constant 0 : index
    %c0_0 = arith.constant 0 : index
    %c0_1 = arith.constant 0 : index
    %0 = vector.load %arg1[%c0, %c0_0, %c0_1] : memref<1x8x32xf32, #tpu.memory_space<vmem>>, vector<1x8x32xf32>
    %1 = vector.shape_cast %0 : vector<1x8x32xf32> to vector<8x32xf32>
    %c0_2 = arith.constant 0 : index
    %c0_3 = arith.constant 0 : index
    %2 = vector.load %arg2[%c0_2, %c0_3] : memref<1x32xf32, #tpu.memory_space<vmem>>, vector<1x32xf32>
    %c0_4 = arith.constant 0 : index
    %c0_5 = arith.constant 0 : index
    %3 = vector.load %arg3[%c0_4, %c0_5] : memref<1x32xf32, #tpu.memory_space<vmem>>, vector<1x32xf32>
    %cst = arith.constant dense<0.000000e+00> : vector<8xf32>
    %4 = vector.multi_reduction <add>, %1, %cst [1] : vector<8x32xf32> to vector<8xf32>
    %5 = vector.shape_cast %4 : vector<8xf32> to vector<8x1xf32>
    %cst_6 = arith.constant 3.200000e+01 : f32
    %6 = vector.broadcast %cst_6 : f32 to vector<8x1xf32>
    %7 = arith.divf %5, %6 : vector<8x1xf32>
    %8 = vector.broadcast %7 : vector<8x1xf32> to vector<8x32xf32>
    %9 = arith.subf %1, %8 : vector<8x32xf32>
    %10 = arith.mulf %9, %9 : vector<8x32xf32>
    %cst_7 = arith.constant dense<0.000000e+00> : vector<8xf32>
    %11 = vector.multi_reduction <add>, %10, %cst_7 [1] : vector<8x32xf32> to vector<8xf32>
    %12 = vector.shape_cast %11 : vector<8xf32> to vector<8x1xf32>
    %cst_8 = arith.constant 3.200000e+01 : f32
    %13 = vector.broadcast %cst_8 : f32 to vector<8x1xf32>
    %14 = arith.divf %12, %13 : vector<8x1xf32>
    %15 = vector.broadcast %7 : vector<8x1xf32> to vector<8x32xf32>
    %16 = arith.subf %1, %15 : vector<8x32xf32>
    %cst_9 = arith.constant 9.99999974E-6 : f32
    %17 = vector.broadcast %cst_9 : f32 to vector<8x1xf32>
    %18 = arith.addf %14, %17 : vector<8x1xf32>
    %19 = math.rsqrt %18 : vector<8x1xf32>
    %20 = vector.broadcast %19 : vector<8x1xf32> to vector<8x32xf32>
    %21 = arith.mulf %16, %20 : vector<8x32xf32>
    %22 = vector.broadcast %2 : vector<1x32xf32> to vector<8x32xf32>
    %23 = arith.mulf %21, %22 : vector<8x32xf32>
    %24 = vector.broadcast %3 : vector<1x32xf32> to vector<8x32xf32>
    %25 = arith.addf %23, %24 : vector<8x32xf32>
    %c0_10 = arith.constant 0 : index
    %c0_11 = arith.constant 0 : index
    %26 = vector.load %arg4[%c0_10, %c0_11] : memref<32x128xf32, #tpu.memory_space<vmem>>, vector<32x128xf32>
    %cst_12 = arith.constant dense<0.000000e+00> : vector<8x128xf32>
    %27 = tpu.matmul %25, %26, %cst_12 {dimension_numbers = #tpu.dot_dimension_numbers<[1], [0], [0], [1], [0, 0, 1, 1], [], []>} : vector<8x32xf32>, vector<32x128xf32>, vector<8x128xf32> -> vector<8x128xf32>
    %c0_13 = arith.constant 0 : index
    %c0_14 = arith.constant 0 : index
    %28 = vector.load %arg5[%c0_13, %c0_14] : memref<1x128xf32, #tpu.memory_space<vmem>>, vector<1x128xf32>
    %29 = vector.broadcast %28 : vector<1x128xf32> to vector<8x128xf32>
    %30 = arith.addf %27, %29 : vector<8x128xf32>
    %cst_15 = arith.constant 1.702000e+00 : f32
    %31 = vector.broadcast %cst_15 : f32 to vector<8x128xf32>
    %32 = arith.mulf %31, %30 : vector<8x128xf32>
    %33 = arith.negf %32 : vector<8x128xf32>
    %34 = math.exp %33 : vector<8x128xf32>
    %cst_16 = arith.constant 1.000000e+00 : f32
    %35 = vector.broadcast %cst_16 : f32 to vector<8x128xf32>
    %36 = arith.addf %35, %34 : vector<8x128xf32>
    %37 = arith.divf %35, %36 : vector<8x128xf32>
    %38 = arith.mulf %30, %37 : vector<8x128xf32>
    %c0_17 = arith.constant 0 : index
    %c0_18 = arith.constant 0 : index
    %39 = vector.load %arg6[%c0_17, %c0_18] : memref<128x32xf32, #tpu.memory_space<vmem>>, vector<128x32xf32>
    %cst_19 = arith.constant dense<0.000000e+00> : vector<8x32xf32>
    %40 = tpu.matmul %38, %39, %cst_19 {dimension_numbers = #tpu.dot_dimension_numbers<[1], [0], [0], [1], [0, 0, 1, 1], [], []>} : vector<8x128xf32>, vector<128x32xf32>, vector<8x32xf32> -> vector<8x32xf32>
    %c0_20 = arith.constant 0 : index
    %c0_21 = arith.constant 0 : index
    %41 = vector.load %arg7[%c0_20, %c0_21] : memref<1x32xf32, #tpu.memory_space<vmem>>, vector<1x32xf32>
    %42 = vector.broadcast %41 : vector<1x32xf32> to vector<8x32xf32>
    %43 = arith.addf %40, %42 : vector<8x32xf32>
    %44 = arith.addf %1, %43 : vector<8x32xf32>
    %c0_22 = arith.constant 0 : index
    %c0_23 = arith.constant 0 : index
    %c0_24 = arith.constant 0 : index
    %45 = vector.load %arg8[%c0_22, %c0_23, %c0_24] : memref<1x8x32xf32, #tpu.memory_space<vmem>>, vector<1x8x32xf32>
    %46 = vector.shape_cast %45 : vector<1x8x32xf32> to vector<8x32xf32>
    %47 = vector.shape_cast %44 : vector<8x32xf32> to vector<1x8x32xf32>
    tpu.vector_store %arg8[%c0_22, %c0_23, %c0_24], %47 {strides = array<i32>} : memref<1x8x32xf32, #tpu.memory_space<vmem>>, vector<1x8x32xf32>,
    return
  }
  func.func @transform_0(%arg0: i32) -> (i32, i32, i32) {
    %c0_i32 = arith.constant 0 : i32
    %c0_i32_0 = arith.constant 0 : i32
    %c0_i32_1 = arith.constant 0 : i32
    return %arg0, %c0_i32, %c0_i32_0 : i32, i32, i32
  }
  func.func @transform_1(%arg0: i32) -> (i32, i32) {
    %c0_i32 = arith.constant 0 : i32
    %c0_i32_0 = arith.constant 0 : i32
    %c0_i32_1 = arith.constant 0 : i32
    return %c0_i32, %c0_i32_0 : i32, i32
  }
  func.func @transform_2(%arg0: i32) -> (i32, i32) {
    %c0_i32 = arith.constant 0 : i32
    %c0_i32_0 = arith.constant 0 : i32
    %c0_i32_1 = arith.constant 0 : i32
    return %c0_i32, %c0_i32_0 : i32, i32
  }
  func.func @transform_3(%arg0: i32) -> (i32, i32) {
    %c0_i32 = arith.constant 0 : i32
    %c0_i32_0 = arith.constant 0 : i32
    %c0_i32_1 = arith.constant 0 : i32
    return %c0_i32, %c0_i32_0 : i32, i32
  }
  func.func @transform_4(%arg0: i32) -> (i32, i32) {
    %c0_i32 = arith.constant 0 : i32
    %c0_i32_0 = arith.constant 0 : i32
    %c0_i32_1 = arith.constant 0 : i32
    return %c0_i32, %c0_i32_0 : i32, i32
  }
  func.func @transform_5(%arg0: i32) -> (i32, i32) {
    %c0_i32 = arith.constant 0 : i32
    %c0_i32_0 = arith.constant 0 : i32
    %c0_i32_1 = arith.constant 0 : i32
    return %c0_i32, %c0_i32_0 : i32, i32
  }
  func.func @transform_6(%arg0: i32) -> (i32, i32) {
    %c0_i32 = arith.constant 0 : i32
    %c0_i32_0 = arith.constant 0 : i32
    %c0_i32_1 = arith.constant 0 : i32
    return %c0_i32, %c0_i32_0 : i32, i32
  }
  func.func @transform_7(%arg0: i32) -> (i32, i32, i32) {
    %c0_i32 = arith.constant 0 : i32
    %c0_i32_0 = arith.constant 0 : i32
    %c0_i32_1 = arith.constant 0 : i32
    return %arg0, %c0_i32, %c0_i32_0 : i32, i32, i32
  }
}

module attributes {stable_mosaic.version = 11 : i64} {
  func.func @_ln_proj_kernel(%arg0: i32, %arg1: i32, %arg2: memref<2x32xf32, #tpu.memory_space<vmem>>, %arg3: memref<1x32xf32, #tpu.memory_space<vmem>>, %arg4: memref<1x32xf32, #tpu.memory_space<vmem>>, %arg5: memref<32x16xf32, #tpu.memory_space<vmem>>, %arg6: memref<2x16xf32, #tpu.memory_space<vmem>>) attributes {dimension_semantics = [#tpu.dimension_semantics<parallel>, #tpu.dimension_semantics<parallel>], iteration_bounds = array<i64: 1, 1>, scalar_prefetch = 0 : i64, scratch_operands = 0 : i64, tpu.core_type = #tpu.core_type<tc>, window_params = [{transform_indices = @transform_0, window_bounds = array<i64: 2, 32>}, {pipeline_mode = #tpu.pipeline_mode<synchronous>, transform_indices = @transform_1, window_bounds = array<i64: 1, 32>}, {pipeline_mode = #tpu.pipeline_mode<synchronous>, transform_indices = @transform_2, window_bounds = array<i64: 1, 32>}, {transform_indices = @transform_3, window_bounds = array<i64: 32, 16>}, {transform_indices = @transform_4, window_bounds = array<i64: 2, 16>}]} {
    %c0 = arith.constant 0 : index
    %c0_0 = arith.constant 0 : index
    %0 = vector.load %arg2[%c0, %c0_0] : memref<2x32xf32, #tpu.memory_space<vmem>>, vector<2x32xf32>
    %c0_1 = arith.constant 0 : index
    %c0_2 = arith.constant 0 : index
    %1 = vector.load %arg3[%c0_1, %c0_2] : memref<1x32xf32, #tpu.memory_space<vmem>>, vector<1x32xf32>
    %c0_3 = arith.constant 0 : index
    %c0_4 = arith.constant 0 : index
    %2 = vector.load %arg4[%c0_3, %c0_4] : memref<1x32xf32, #tpu.memory_space<vmem>>, vector<1x32xf32>
    %cst = arith.constant dense<0.000000e+00> : vector<2xf32>
    %3 = vector.multi_reduction <add>, %0, %cst [1] : vector<2x32xf32> to vector<2xf32>
    %4 = vector.shape_cast %3 : vector<2xf32> to vector<2x1xf32>
    %cst_5 = arith.constant 3.200000e+01 : f32
    %5 = vector.broadcast %cst_5 : f32 to vector<2x1xf32>
    %6 = arith.divf %4, %5 : vector<2x1xf32>
    %7 = vector.broadcast %6 : vector<2x1xf32> to vector<2x32xf32>
    %8 = arith.subf %0, %7 : vector<2x32xf32>
    %9 = arith.mulf %8, %8 : vector<2x32xf32>
    %cst_6 = arith.constant dense<0.000000e+00> : vector<2xf32>
    %10 = vector.multi_reduction <add>, %9, %cst_6 [1] : vector<2x32xf32> to vector<2xf32>
    %11 = vector.shape_cast %10 : vector<2xf32> to vector<2x1xf32>
    %cst_7 = arith.constant 3.200000e+01 : f32
    %12 = vector.broadcast %cst_7 : f32 to vector<2x1xf32>
    %13 = arith.divf %11, %12 : vector<2x1xf32>
    %14 = vector.broadcast %6 : vector<2x1xf32> to vector<2x32xf32>
    %15 = arith.subf %0, %14 : vector<2x32xf32>
    %cst_8 = arith.constant 9.99999974E-6 : f32
    %16 = vector.broadcast %cst_8 : f32 to vector<2x1xf32>
    %17 = arith.addf %13, %16 : vector<2x1xf32>
    %18 = math.rsqrt %17 : vector<2x1xf32>
    %19 = vector.broadcast %18 : vector<2x1xf32> to vector<2x32xf32>
    %20 = arith.mulf %15, %19 : vector<2x32xf32>
    %21 = vector.broadcast %1 : vector<1x32xf32> to vector<2x32xf32>
    %22 = arith.mulf %20, %21 : vector<2x32xf32>
    %23 = vector.broadcast %2 : vector<1x32xf32> to vector<2x32xf32>
    %24 = arith.addf %22, %23 : vector<2x32xf32>
    %c0_9 = arith.constant 0 : index
    %c0_10 = arith.constant 0 : index
    %25 = vector.load %arg5[%c0_9, %c0_10] : memref<32x16xf32, #tpu.memory_space<vmem>>, vector<32x16xf32>
    %cst_11 = arith.constant dense<0.000000e+00> : vector<2x16xf32>
    %26 = tpu.matmul %24, %25, %cst_11 {dimension_numbers = #tpu.dot_dimension_numbers<[1], [0], [0], [1], [0, 0, 1, 1], [], []>} : vector<2x32xf32>, vector<32x16xf32>, vector<2x16xf32> -> vector<2x16xf32>
    %c0_12 = arith.constant 0 : index
    %c0_13 = arith.constant 0 : index
    %27 = vector.load %arg6[%c0_12, %c0_13] : memref<2x16xf32, #tpu.memory_space<vmem>>, vector<2x16xf32>
    tpu.vector_store %arg6[%c0_12, %c0_13], %26 {strides = array<i32>} : memref<2x16xf32, #tpu.memory_space<vmem>>, vector<2x16xf32>,
    return
  }
  func.func @transform_0(%arg0: i32, %arg1: i32) -> (i32, i32) {
    %c0_i32 = arith.constant 0 : i32
    %c0_i32_0 = arith.constant 0 : i32
    return %arg0, %c0_i32 : i32, i32
  }
  func.func @transform_1(%arg0: i32, %arg1: i32) -> (i32, i32) {
    %c0_i32 = arith.constant 0 : i32
    %c0_i32_0 = arith.constant 0 : i32
    %c0_i32_1 = arith.constant 0 : i32
    return %c0_i32, %c0_i32_0 : i32, i32
  }
  func.func @transform_2(%arg0: i32, %arg1: i32) -> (i32, i32) {
    %c0_i32 = arith.constant 0 : i32
    %c0_i32_0 = arith.constant 0 : i32
    %c0_i32_1 = arith.constant 0 : i32
    return %c0_i32, %c0_i32_0 : i32, i32
  }
  func.func @transform_3(%arg0: i32, %arg1: i32) -> (i32, i32) {
    %c0_i32 = arith.constant 0 : i32
    %c0_i32_0 = arith.constant 0 : i32
    return %c0_i32, %arg1 : i32, i32
  }
  func.func @transform_4(%arg0: i32, %arg1: i32) -> (i32, i32) {
    %c0_i32 = arith.constant 0 : i32
    return %arg0, %arg1 : i32, i32
  }
}

</mosaic_0001>

<bundles_post_ra>
// kernel: text_encoder_forward.10
= control target key start
LH: loop header
LB: loop body
LE: loop exit
PB: predicated region body
PF: predicated region fallthrough
CT: control target
= control target key end

     0   :  { %s218_s9 = smov 0   ;;  %s246_s0 = inlined_call_operand.vmem [shape: f32[2,8,32], index: 0, kind: input, shape index: {}]   ;;  %s247_s1 = inlined_call_operand.vmem [shape: f32[8,32], index: 1, kind: input, shape index: {}]   ;;  %s248_s2 = inlined_call_operand.vmem [shape: f32[2,8,32], index: 2, kind: output, shape index: {}]  }
   0x1 LB: > { %s197_s10 = sadd.s32 4294967295, %s220_s9   ;;  %p201_p0 = scmp.ge.s32.totalorder %s220_s9, 1  ;;  %s220_s9 = sphi %s218_s9, %s12_s9  }
   0x2   : > { %p111_p1 = scmp.lt.s32.totalorder %s220_s9, 3 }
   0x4   : > { %p112_p2 = pnand %p201_p0, %p111_p1 }
   0x5   : > { %p131_p3 = scmp.lt.s32.totalorder (!%p112_p2), %s197_s10, 1 }
   0x6   : > { %115 = sbr.rel (%p112_p2) target bundleno = 18 (0x12), region = 28 }
   0xb   : > { %s250_s10 = smov (!%p131_p3, %s197_s10), 1  ;;  %v140_v0 = vld [vmem:[%s247_s1] sm:$0xff]  ;;  %vm142_vm0 = vcmask 261120  }
   0xc   : > { %s202_s11 = sshll.u32 %s250_s10, 3 }
   0xd   : > { %s134_s16 = scalar_lea.vmem %s246_s0, %s202_s11  ;;  %s138_s19 = scalar_lea.vmem %s248_s2, %s202_s11 }
   0xe   : > { %v139_v1 = vld [vmem:[%s134_s16] sm:$0xff] }
   0xf   : > { %v141_v2 = vadd.f32 %v140_v0, %v139_v1 }
  0x11   : > { %143 = vst.msk [vmem:[%s138_s19] sm:$0xff] %vm142_vm0, %v141_v2 }
  0x12 PF: > { %s12_s9 = sadd.s32 1, %s220_s9  }
  0x13   : > { %p9_p4 = scmp.ge.s32.totalorder %s12_s9, 4  }
  0x15   :  { %11 = sbr.rel (!%p9_p4) target bundleno = 1 (0x1), region = 58 }

// kernel: text_encoder_forward.11
= control target key start
LH: loop header
LB: loop body
LE: loop exit
PB: predicated region body
PF: predicated region fallthrough
CT: control target
= control target key end

     0   :  { %10 = vsyncpa [#allocation3], 0  ;;  %s888_s0 = inlined_call_operand.vmem [shape: f32[2,8,32], index: 0, kind: input, shape index: {}]   ;;  %s889_s1 = inlined_call_operand.hbm [shape: f32[1,32], index: 1, kind: input, shape index: {}]   ;;  %s890_s2 = inlined_call_operand.hbm [shape: f32[1,32], index: 2, kind: input, shape index: {}]   ;;  %s891_s3 = inlined_call_operand.hbm [shape: f32[32,96], index: 3, kind: input, shape index: {}]   ;;  %s892_s4 = inlined_call_operand.hbm [shape: f32[1,96], index: 4, kind: input, shape index: {}]   ;;  %s893_s5 = inlined_call_operand.vmem [shape: f32[2,8,96], index: 5, kind: output, shape index: {}]  }
   0x1   :  { %11 = vsyncpa [#allocation5], 0 }
   0x2   :  { %12 = vsyncpa [#allocation8], 0  ;;  %s790_s18 = smov 0   ;;  %s792_s19 = smov 0  }
   0x3   :  { %s794_s20 = smov 0  }
   0x4 LB: > { %s207_s23 = sshll.u32 %s890_s2, 4  ;;  %s504_s24 = sadd.s32 4294967295, %s751_s20   ;;  %s751_s20 = sphi %s794_s20, %s18_s20   ;;  %s747_s19 = sphi %s792_s19, %s898_s19   ;;  %s743_s18 = sphi %s790_s18, %s897_s18   ;;  %s208_s23 = int_to_ptr.hbm [resolvable:$true] %s207_s23 }
   0x5   : > { %p506_p0 = scmp.ge.s32.totalorder %s751_s20, 1  ;;  %p183_p1 = scmp.lt.s32.totalorder %s751_s20, 3 }
   0x6   : > { %p811_p2 = scmp.eq.s32.totalorder %s504_s24, 0  ;;  %s753_s27 = smov [#allocation4]  }
   0x7   : > { %p815_p3 = pnand %p506_p0, %p183_p1  ;;  %s209_s28 = sshll.u32 %s753_s27, 4  ;;  %s210_s28 = int_to_ptr.vmem [resolvable:$true] %s209_s28 }
   0x8   : > { %s30_s30 = sadd.s32 1, %s747_s19  ;;  %s195_s8 = sshll.u32 %s889_s1, 4  ;;  %s196_s8 = int_to_ptr.hbm [resolvable:$true] %s195_s8 }
   0x9   : > { %p538_p4 = pneg %p815_p3  ;;  %p32_p6 = scmp.ge.s32.totalorder %s30_s30, 2 }
   0xa   : > { %s220_s11 = sshll.u32 %s891_s3, 4  ;;  %s754_s12 = smov [#allocation2]   ;;  %s221_s11 = int_to_ptr.hbm [resolvable:$true] %s220_s11 }
   0xb   : > { %p823_p5 = pnand %p811_p2, %p538_p4  ;;  %s900_s30 = smov (%p32_p6, %s30_s30), 0 }
   0xc   : > { %s197_s13 = sshll.u32 %s754_s12, 4  ;;  %s755_s14 = smov [#allocation6]   ;;  %s198_s13 = int_to_ptr.vmem [resolvable:$true] %s197_s13 }
   0xd   : > { %544 = dma.hbm_to_vmem [thread:$0]  (!%p823_p5), %s208_s23, 16, %s210_s28, [#allocation5]  }
   0xe   : > { %541 = dma.hbm_to_vmem [thread:$0]  (!%p823_p5), %s196_s8, 16, %s198_s13, [#allocation3]  }
   0xf   : > { %s222_s15 = sshll.u32 %s755_s14, 4  ;;  %s756_s16 = smov 128   ;;  %s223_s15 = int_to_ptr.vmem [resolvable:$true] %s222_s15 }
  0x10   : > { %s757_s17 = smov 8   ;;  %s236_s23 = sshll.u32 %s892_s4, 4  ;;  %s237_s23 = int_to_ptr.hbm [resolvable:$true] %s236_s23 }
  0x11   : > { %547 = dma.hbm_to_vmem [thread:$0]  (!%p823_p5), %s221_s11, 512, %s223_s15, [#allocation5], %s756_s16, %s756_s16, %s757_s17  }
  0x12   : > { %s758_s24 = smov [#allocation7]   ;;  %258 = sbr.rel (%p815_p3) target bundleno = 431 (0x1af), region = 40 }
  0x13   : > { %s238_s27 = sshll.u32 %s758_s24, 4  ;;  %s239_s27 = int_to_ptr.vmem [resolvable:$true] %s238_s27 }
  0x14   : > { %550 = dma.hbm_to_vmem [thread:$0]  (!%p823_p5), %s237_s23, 16, %s239_s27, [#allocation8]  }
  0x17   : > { %730 = dma.done.wait (%p811_p2), [#allocation3], 16  }
  0x18   : > { %732 = vsyncadd (%p811_p2), [#allocation3], 4294967280 }
  0x19   : > { %734 = dma.done.wait (%p811_p2), [#allocation5], 528  }
  0x1a   : > { %736 = vsyncadd (%p811_p2), [#allocation5], 4294966768 }
  0x1b   : > { %738 = dma.done.wait (%p811_p2), [#allocation8], 16  }
  0x1c   : > { %740 = vsyncadd (%p811_p2), [#allocation8], 4294967280  ;;  %p303_p7 = scmp.lt.s32.totalorder %s743_s18, 1  ;;  %vm317_vm0 = vcmask 261120   ;;  %v759_v2 = vmov 32.0   ;;  %v358_v14 = vld [vmem:[#allocation6 + $0x18] sm:$0xff] }
  0x1d   : > { %593 = vrcp.f32 %v759_v2  ;;  %378 = vmatpush.msra.mxu0 %v358_v14  ;;  %v357_v15 = vld [vmem:[#allocation6 + $0x10] sm:$0xff]  ;;  %v356_v16 = vld [vmem:[#allocation6 + $0x8] sm:$0xff]  ;;  %v355_v17 = vld [vmem:[#allocation6] sm:$0xff]  ;;  %vm386_vm5 = vcmask 785408  }
  0x1e   : > { %s902_s18 = smov (!%p303_p7, %s743_s18), 1  ;;  %v590_v27 = vld [vmem:[#allocation2] ss:$0 sm:$0xff]  ;;  %v591_v30 = vld [vmem:[#allocation4] ss:$0 sm:$0xff] }
  0x1f   : > { %s517_s26 = sshll.u32 %s902_s18, 3  ;;  %379 = vmatpush.msra.mxu0 %v357_v15  ;;  %v592_v33 = vld [vmem:[#allocation7] ss:$0 sm:$0xff] }
  0x20   : > { %s306_s6 = scalar_lea.vmem %s888_s0, %s517_s26  ;;  %s313_s8 = scalar_lea.vmem %s893_s5, %s517_s26 }
  0x21   : > { %v314_v0 = vld [vmem:[%s306_s6] sm:$0xff]  ;;  %380 = vmatpush.msra.mxu0 %v356_v16 }
  0x22   : > { %v318_v1 = vsel %vm317_vm0, %v314_v0, 0.0 }
  0x23   : > { %319 = vadd.xlane.f32.xlu0 %v318_v1  ;;  %v594_v3 = vpop.eup %593  ;;  %381 = vmatpush.msra.mxu0 %v355_v17 }
  0x24   : > { %v322_v4 = vmul.f32 32.0, %v594_v3  ;;  %vm326_vm1 = vweird.f32 %v594_v3 }
  0x26   : > { %v323_v5 = vsub.f32 1.0, %v322_v4 }
  0x28   : > { %v324_v6 = vmul.f32 %v594_v3, %v323_v5 }
  0x2a   : > { %v325_v7 = vadd.f32 %v594_v3, %v324_v6 }
  0x2c   : > { %v327_v8 = vsel %vm326_vm1, %v594_v3, %v325_v7 }
  0x96   : > { %v320_v9 = vpop.xlane.xlu0 %319 }
  0x97   : > { %v328_v10 = vmul.f32 %v327_v8, %v320_v9 }
  0x99   : > { %v329_v11 = vsub.f32 %v314_v0, %v328_v10 }
  0x9b   : > { %v330_v12 = vmul.f32 %v329_v11, %v329_v11 }
  0x9d   : > { %v331_v13 = vsel %vm317_vm0, %v330_v12, 0.0 }
  0x9e   : > { %332 = vadd.xlane.f32.xlu0 %v331_v13 }
 0x111   : > { %v333_v18 = vpop.xlane.xlu0 %332 }
 0x112   : > { %v334_v19 = vmul.f32 %v333_v18, %v327_v8 }
 0x114   : > { %v335_v20 = vadd.f32 1e-05, %v334_v19 }
 0x116   : > { %595 = vrsqrt.f32 %v335_v20  ;;  %vm342_vm3 = vweird.f32 %v335_v20 }
 0x11c   : > { %v596_v21 = vpop.eup %595 }
 0x11d   : > { %v337_v22 = vmul.f32 %v596_v21, %v335_v20  ;;  %vm343_vm2 = vweird.f32 %v596_v21 }
 0x11e   : > { %vm344_vm4 = vmor %vm342_vm3, %vm343_vm2 }
 0x11f   : > { %v338_v23 = vmul.f32 %v596_v21, %v337_v22 }
 0x121   : > { %v339_v24 = vmul.f32 0.5, %v338_v23 }
 0x123   : > { %v340_v25 = vsub.f32 1.5, %v339_v24 }
 0x125   : > { %v341_v26 = vmul.f32 %v596_v21, %v340_v25 }
 0x127   : > { %v345_v28 = vsel %vm344_vm4, %v596_v21, %v341_v26 }
 0x128   : > { %v346_v29 = vmul.f32 %v345_v28, %v329_v11 }
 0x12a   : > { %v350_v31 = vmul.f32 %v590_v27, %v346_v29 }
 0x12c   : > { %v354_v32 = vadd.f32 %v591_v30, %v350_v31 }
 0x12e   : > { %519 = vmatmul.msk.f32.vlgmr.msra.gmra.mxu0 %vm317_vm0, %v354_v32 }
 0x1ab   : > { %v383_v34 = vpop.f32.mrf.mxu0 }
 0x1ac   : > { %v384_v35 = vadd.f32 %v592_v33, %v383_v34 }
 0x1ae   : > { %387 = vst.msk [vmem:[%s313_s8] sm:$0xff] %vm386_vm5, %v384_v35 }
 0x1af PF: > { %s18_s20 = sadd.s32 1, %s751_s20   ;;  %s897_s18 = smov %s747_s19 }
 0x1b0   : > { %p15_p8 = scmp.ge.s32.totalorder %s18_s20, 4   ;;  %s898_s19 = smov %s900_s30 }
 0x1b2   :  { %17 = sbr.rel (!%p15_p8) target bundleno = 4 (0x4), region = 89 }
 0x1b7   :  { %413 = vsyncpa [#allocation3], 1 }
 0x1b8   :  { %415 = vsyncpa [#allocation3 + $0x1], 1 }
 0x1b9   :  { %416 = vsyncpa [#allocation5], 1 }
 0x1ba   :  { %417 = vsyncpa [#allocation8], 1 }

// kernel: text_encoder_forward.13
= control target key start
LH: loop header
LB: loop body
LE: loop exit
PB: predicated region body
PF: predicated region fallthrough
CT: control target
= control target key end

     0   :  { %9 = vsyncpa [#allocation3], 0  ;;  %s566_s15 = smov 0   ;;  %s568_s16 = smov 0   ;;  %s609_s0 = inlined_call_operand.vmem [shape: f32[2,8,32], index: 0, kind: input, shape index: {}]   ;;  %s610_s1 = inlined_call_operand.hbm [shape: f32[32,32], index: 1, kind: input, shape index: {}]   ;;  %s611_s2 = inlined_call_operand.vmem [shape: f32[1,32], index: 2, kind: input, shape index: {}]   ;;  %s612_s3 = inlined_call_operand.vmem [shape: f32[2,8,32], index: 3, kind: input, shape index: {}]   ;;  %s613_s4 = inlined_call_operand.vmem [shape: f32[2,8,32], index: 4, kind: output, shape index: {}]  }
   0x1   :  { %s570_s17 = smov 0  }
   0x2 LB: > { %s428_s18 = sadd.s32 4294967295, %s536_s17   ;;  %s27_s19 = sadd.s32 1, %s532_s16  ;;  %s536_s17 = sphi %s570_s17, %s15_s17   ;;  %s532_s16 = sphi %s568_s16, %s615_s16   ;;  %s528_s15 = sphi %s566_s15, %s614_s15  }
   0x3   : > { %p29_p0 = scmp.ge.s32.totalorder %s27_s19, 2  ;;  %p430_p1 = scmp.ge.s32.totalorder %s536_s17, 1 }
   0x4   : > { %p166_p2 = scmp.lt.s32.totalorder %s536_s17, 3  ;;  %p450_p4 = scmp.eq.s32.totalorder %s428_s18, 0 }
   0x5   : > { %s617_s19 = smov (%p29_p0, %s27_s19), 0  ;;  %s179_s22 = sshll.u32 %s610_s1, 4  ;;  %s180_s22 = int_to_ptr.hbm [resolvable:$true] %s179_s22 }
   0x6   : > { %p167_p3 = pnand %p430_p1, %p166_p2  ;;  %s538_s23 = smov [#allocation2]  }
   0x7   : > { %s181_s24 = sshll.u32 %s538_s23, 4  ;;  %s539_s25 = smov 128   ;;  %s182_s24 = int_to_ptr.vmem [resolvable:$true] %s181_s24 }
   0x8   : > { %p446_p5 = pneg %p167_p3  ;;  %s540_s26 = smov 8  }
   0x9   : > { %220 = sbr.rel (%p167_p3) target bundleno = 154 (0x9a), region = 36 }
   0xa   : > { %p447_p6 = pnand %p450_p4, %p446_p5 }
   0xc   : > { %449 = dma.hbm_to_vmem [thread:$0]  (!%p447_p6), %s180_s22, 512, %s182_s24, [#allocation3], %s539_s25, %s539_s25, %s540_s26  }
   0xe   : > { %523 = dma.done.wait (%p450_p4), [#allocation3], 512  }
   0xf   : > { %525 = vsyncadd (%p450_p4), [#allocation3], 4294966784  ;;  %p258_p7 = scmp.lt.s32.totalorder %s528_s15, 1  ;;  %v283_v0 = vld [vmem:[#allocation2 + $0x18] sm:$0xff]  ;;  %v282_v1 = vld [vmem:[#allocation2 + $0x10] sm:$0xff]  ;;  %vm288_vm0 = vcmask 261120  }
  0x10   : > { %304 = vmatpush.msra.mxu0 %v283_v0  ;;  %v281_v2 = vld [vmem:[#allocation2 + $0x8] sm:$0xff]  ;;  %v280_v3 = vld [vmem:[#allocation2] sm:$0xff] }
  0x11   : > { %s619_s15 = smov (!%p258_p7, %s528_s15), 1  ;;  %v479_v5 = vld [vmem:[%s611_s2] ss:$0 sm:$0xff] }
  0x12   : > { %s436_s27 = sshll.u32 %s619_s15, 3  ;;  %305 = vmatpush.msra.mxu0 %v282_v1 }
  0x13   : > { %s261_s30 = scalar_lea.vmem %s609_s0, %s436_s27  ;;  %s271_s7 = scalar_lea.vmem %s612_s3, %s436_s27 }
  0x14   : > { %306 = vmatpush.msra.mxu0 %v281_v2  ;;  %v279_v4 = vld [vmem:[%s261_s30] sm:$0xff]  ;;  %s278_s12 = scalar_lea.vmem %s613_s4, %s436_s27 }
  0x15   : > { %v312_v7 = vld [vmem:[%s271_s7] sm:$0xff] }
  0x16   : > { %307 = vmatpush.msra.mxu0 %v280_v3 }
  0x17   : > { %439 = vmatmul.msk.f32.vlgmr.msra.gmra.mxu0 %vm288_vm0, %v279_v4 }
  0x94   : > { %v309_v6 = vpop.f32.mrf.mxu0 }
  0x95   : > { %v310_v8 = vadd.f32 %v479_v5, %v309_v6 }
  0x97   : > { %v313_v9 = vadd.f32 %v312_v7, %v310_v8 }
  0x99   : > { %314 = vst.msk [vmem:[%s278_s12] sm:$0xff] %vm288_vm0, %v313_v9 }
  0x9a PF: > { %s15_s17 = sadd.s32 1, %s536_s17   ;;  %s614_s15 = smov %s532_s16 }
  0x9b   : > { %p12_p8 = scmp.ge.s32.totalorder %s15_s17, 4   ;;  %s615_s16 = smov %s617_s19 }
  0x9d   :  { %14 = sbr.rel (!%p12_p8) target bundleno = 2 (0x2), region = 78 }
  0xa2   :  { %340 = vsyncpa [#allocation3], 1 }
  0xa3   :  { %342 = vsyncpa [#allocation3 + $0x1], 1 }

// kernel: text_encoder_forward.12
= control target key start
LH: loop header
LB: loop body
LE: loop exit
PB: predicated region body
PF: predicated region fallthrough
CT: control target
= control target key end

     0   :  { %s629_s9 = smov 0   ;;  %s700_s0 = inlined_call_operand.vmem [shape: f32[2,8,96], index: 0, kind: input, shape index: {}]   ;;  %s701_s1 = inlined_call_operand.vmem [shape: f32[8,8], index: 1, kind: input, shape index: {}]   ;;  %s702_s2 = inlined_call_operand.vmem [shape: f32[2,8,32], index: 2, kind: output, shape index: {}]  }
   0x1 LB: > { %s533_s10 = sadd.s32 4294967295, %s598_s9   ;;  %p537_p0 = scmp.ge.s32.totalorder %s598_s9, 1  ;;  %s598_s9 = sphi %s629_s9, %s12_s9  }
   0x2   : > { %p111_p1 = scmp.lt.s32.totalorder %s598_s9, 3 }
   0x4   : > { %p112_p2 = pnand %p537_p0, %p111_p1 }
   0x5   : > { %p131_p3 = scmp.lt.s32.totalorder (!%p112_p2), %s533_s10, 1  ;;  %s600_s15 = smov (!%p112_p2), 96  }
   0x6   : > { %115 = sbr.rel (%p112_p2) target bundleno = 1175 (0x497), region = 28  ;;  %s601_s16 = smov (!%p112_p2), 88  }
   0x7   : > { %s602_s17 = smov (!%p112_p2), 120   ;;  %s603_s20 = smov (!%p112_p2), 64  }
   0x8   : > { %s604_s21 = smov (!%p112_p2), 80   ;;  %s605_s22 = smov (!%p112_p2), 72  }
   0x9   : > { %s606_s23 = smov (!%p112_p2), 112   ;;  %s607_s24 = smov (!%p112_p2), 104  }
   0xa   : > { %s608_s25 = smov (!%p112_p2), 56   ;;  %s609_s26 = smov (!%p112_p2), 40  }
   0xb   : > { %s704_s10 = smov (!%p131_p3, %s533_s10), 1  ;;  %vm144_vm0 = vcmask 64512   ;;  %v657_v4 = vld [vmem:[%s701_s1] sm:$0xff]  ;;  %s610_s27 = smov 48  }
   0xc   : > { %s538_s11 = sshll.u32 %s704_s10, 3  ;;  %s611_s28 = smov 8  }
   0xd   : > { %s134_s14 = scalar_lea.vmem %s700_s0, %s538_s11  ;;  %s612_s29 = smov 24  }
   0xe   : > { %v645_v0 = vld [vmem:[%s134_s14] sm:$0xff]  ;;  %s613_s30 = smov 16   ;;  %s138_s5 = scalar_lea.vmem %s702_s2, %s538_s11 }
   0xf   : > { %142 = vrot.lane.b32.xlu0 %v645_v0, %s600_s15  ;;  %223 = vrot.lane.b32.xlu1 %v645_v0, %s601_s16 }
  0x10   : > { %221 = vrot.lane.b32.xlu2 %v645_v0, %s602_s17 }
  0x18   : > { %195 = vrot.lane.b32.xlu2 %v645_v0, %s603_s20 }
  0x20   : > { %303 = vrot.lane.b32.xlu2 %v645_v0, %s604_s21 }
  0x28   : > { %383 = vrot.lane.b32.xlu2 %v645_v0, %s605_s22 }
  0x30   : > { %301 = vrot.lane.b32.xlu2 %v645_v0, %s606_s23 }
  0x6a   : > { %v222_v8 = vpop.permute.xlu2 %221 }
  0x72   : > { %v196_v12 = vpop.permute.xlu2 %195 }
  0x73   : > { %216 = vmatpush.msra.mxu1 %v196_v12 }
  0x7a   : > { %v304_v15 = vpop.permute.xlu2 %303 }
  0x7b   : > { %546 = vmatpush.xpose.msk.msrb.mxu1 %vm144_vm0, %v304_v15 }
  0x81   : > { %v143_v1 = vpop.permute.xlu0 %142  ;;  %v224_v2 = vpop.permute.xlu1 %223 }
  0x82   : > { %540 = vmatpush.xpose.msk.msra.mxu0 %vm144_vm0, %v143_v1  ;;  %543 = vmatpush.xpose.msk.msra.mxu2 %vm144_vm0, %v224_v2  ;;  %v384_v20 = vpop.permute.xlu2 %383 }
  0x85   : > { %541 = vmatmul.msk.f32.vlgmr.msra.gmra.mxu0 %vm144_vm0, %v645_v0  ;;  %544 = vmatmul.msk.f32.vlgmr.msra.gmra.mxu2 %vm144_vm0, %v222_v8 }
  0x86   : > { %549 = vmatpush.xpose.msk.msrb.mxu0 %vm144_vm0, %v384_v20 }
  0x8a   : > { %v302_v34 = vpop.permute.xlu2 %301 }
 0x102   : > { %v166_v3 = vpop.f32.mrf.mxu0 }
 0x103   : > { %v169_v5 = vmul.f32 0.35355338, %v166_v3 }
 0x105   : > { %v170_v6 = vadd.f32 %v169_v5, %v657_v4 }
 0x107   : > { %v171_v7 = vsel %vm144_vm0, %v170_v6, -inf }
 0x108   : > { %172 = vmax.xlane.f32.xlu0 %v171_v7  ;;  %v246_v16 = vpop.f32.mrf.mxu2 }
 0x109   : > { %v249_v17 = vmul.f32 0.35355338, %v246_v16 }
 0x10b   : > { %v250_v18 = vadd.f32 %v249_v17, %v657_v4 }
 0x10d   : > { %v251_v19 = vsel %vm144_vm0, %v250_v18, -inf }
 0x10e   : > { %252 = vmax.xlane.f32.xlu2 %v251_v19 }
 0x126   : > { %275 = vrot.lane.b32.xlu2 %v645_v0, %s608_s25 }
 0x17b   : > { %v173_v9 = vpop.xlane.xlu0 %172 }
 0x17c   : > { %v174_v10 = vsub.f32 %v170_v6, %v173_v9 }
 0x17e   : > { %v175_v11 = vmul.f32 1.442695, %v174_v10 }
 0x180   : > { %576 = vpow2.f32 %v175_v11 }
 0x181   : > { %v253_v35 = vpop.xlane.xlu2 %252 }
 0x182   : > { %v254_v37 = vsub.f32 %v250_v18, %v253_v35 }
 0x184   : > { %v255_v38 = vmul.f32 1.442695, %v254_v37 }
 0x186   : > { %v577_v13 = vpop.eup %576 }
 0x187   : > { %v177_v14 = vsel %vm144_vm0, %v577_v13, 0.0 }
 0x188   : > { %178 = vadd.xlane.f32.xlu1 %v177_v14 }
 0x189   : > { %v276_v49 = vpop.permute.xlu2 %275 }
 0x18a   : > { %296 = vmatpush.msra.mxu3 %v276_v49 }
 0x1a1   : > { %381 = vrot.lane.b32.xlu1 %v645_v0, %s607_s24 }
 0x1fb   : > { %v179_v21 = vpop.xlane.xlu1 %178 }
 0x1fc   : > { %578 = vrcp.f32 %v179_v21  ;;  %v191_v25 = vand.u32 2147483648, %v179_v21  ;;  %v189_v27 = vand.u32 2147483647, %v179_v21  ;;  %vm185_vm2 = vweird.f32 %v179_v21 }
 0x1fd   : > { %580 = vpow2.f32 %v255_v38 }
 0x1fe   : > { %v192_v29 = vor.u32 1.1754944e-38, %v191_v25  ;;  %vm190_vm4 = vcmp.eq.f32.partialorder %v189_v27, 8.507059e+37 }
 0x202   : > { %v579_v22 = vpop.eup %578 }
 0x203   : > { %v181_v23 = vmul.f32 %v579_v22, %v179_v21  ;;  %vm186_vm1 = vweird.f32 %v579_v22  ;;  %v581_v47 = vpop.eup %580 }
 0x204   : > { %vm187_vm3 = vmor %vm185_vm2, %vm186_vm1  ;;  %v257_v48 = vsel %vm144_vm0, %v581_v47, 0.0  ;;  %vm474_vm2 = vcmask 130048  }
 0x205   : > { %v182_v24 = vsub.f32 1.0, %v181_v23 }
 0x207   : > { %v183_v26 = vmul.f32 %v579_v22, %v182_v24 }
 0x209   : > { %v184_v28 = vadd.f32 %v579_v22, %v183_v26 }
 0x20b   : > { %v188_v30 = vsel %vm187_vm3, %v579_v22, %v184_v28  ;;  %vm476_vm3 = vcmask 195584  }
 0x20c   : > { %v193_v31 = vsel %vm190_vm4, %v192_v29, %v188_v30  ;;  %vm478_vm4 = vcmask 261120  }
 0x20d   : > { %v194_v32 = vmul.f32 %v577_v13, %v193_v31 }
 0x20f   : > { %542 = vmatmul.msk.f32.vlgmr.msra.gmra.mxu1 %vm144_vm0, %v194_v32 }
 0x213   : > { %v382_v33 = vpop.permute.xlu1 %381 }
 0x214   : > { %550 = vmatmul.msk.f32.vlgmr.msrb.gmra.mxu0 %vm144_vm0, %v382_v33 }
 0x217   : > { %547 = vmatmul.msk.f32.vlgmr.msrb.gmra.mxu1 %vm144_vm0, %v302_v34 }
 0x28c   : > { %v676_v36 = vpop.f32.mrf.mxu1 }
 0x291   : > { %v406_v39 = vpop.f32.mrf.mxu0 }
 0x292   : > { %v409_v40 = vmul.f32 0.35355338, %v406_v39 }
 0x294   : > { %v410_v41 = vadd.f32 %v409_v40, %v657_v4  ;;  %v326_v42 = vpop.f32.mrf.mxu1 }
 0x295   : > { %v329_v43 = vmul.f32 0.35355338, %v326_v42 }
 0x296   : > { %v411_v44 = vsel %vm144_vm0, %v410_v41, -inf }
 0x297   : > { %v330_v45 = vadd.f32 %v329_v43, %v657_v4  ;;  %412 = vmax.xlane.f32.xlu0 %v411_v44 }
 0x299   : > { %v331_v46 = vsel %vm144_vm0, %v330_v45, -inf }
 0x29a   : > { %332 = vmax.xlane.f32.xlu1 %v331_v46 }
 0x29f   : > { %258 = vadd.xlane.f32.xlu0 %v257_v48 }
 0x2b3   : > { %435 = vrot.lane.b32.xlu1 %v645_v0, %s609_s26 }
 0x30a   : > { %v413_v50 = vpop.xlane.xlu0 %412 }
 0x30b   : > { %v414_v51 = vsub.f32 %v410_v41, %v413_v50 }
 0x30d   : > { %v415_v52 = vmul.f32 1.442695, %v414_v51  ;;  %v333_v53 = vpop.xlane.xlu1 %332 }
 0x30e   : > { %v334_v54 = vsub.f32 %v330_v45, %v333_v53 }
 0x30f   : > { %582 = vpow2.f32 %v415_v52 }
 0x310   : > { %v335_v55 = vmul.f32 1.442695, %v334_v54 }
 0x312   : > { %v259_v56 = vpop.xlane.xlu0 %258 }
 0x313   : > { %584 = vrcp.f32 %v259_v56  ;;  %v271_v63 = vand.u32 2147483648, %v259_v56  ;;  %v269_v3 = vand.u32 2147483647, %v259_v56  ;;  %vm265_vm6 = vweird.f32 %v259_v56 }
 0x314   : > { %586 = vpow2.f32 %v335_v55 }
 0x315   : > { %v583_v57 = vpop.eup %582  ;;  %v272_v5 = vor.u32 1.1754944e-38, %v271_v63  ;;  %vm270_vm8 = vcmp.eq.f32.partialorder %v269_v3, 8.507059e+37 }
 0x316   : > { %v417_v58 = vsel %vm144_vm0, %v583_v57, 0.0 }
 0x317   : > { %418 = vadd.xlane.f32.xlu0 %v417_v58 }
 0x319   : > { %v585_v59 = vpop.eup %584 }
 0x31a   : > { %v261_v60 = vmul.f32 %v585_v59, %v259_v56  ;;  %v587_v61 = vpop.eup %586  ;;  %vm266_vm5 = vweird.f32 %v585_v59 }
 0x31b   : > { %v337_v2 = vsel %vm144_vm0, %v587_v61, 0.0  ;;  %vm267_vm7 = vmor %vm265_vm6, %vm266_vm5 }
 0x31c   : > { %v262_v62 = vsub.f32 1.0, %v261_v60 }
 0x31e   : > { %v263_v1 = vmul.f32 %v585_v59, %v262_v62 }
 0x31f   : > { %338 = vadd.xlane.f32.xlu0 %v337_v2 }
 0x320   : > { %v264_v4 = vadd.f32 %v585_v59, %v263_v1 }
 0x322   : > { %v268_v6 = vsel %vm267_vm7, %v585_v59, %v264_v4 }
 0x323   : > { %v273_v7 = vsel %vm270_vm8, %v272_v5, %v268_v6 }
 0x324   : > { %v274_v8 = vmul.f32 %v581_v47, %v273_v7 }
 0x325   : > { %v436_v9 = vpop.permute.xlu1 %435 }
 0x326   : > { %545 = vmatmul.msk.f32.vlgmr.msra.gmra.mxu3 %vm144_vm0, %v274_v8  ;;  %456 = vmatpush.msrb.mxu2 %v436_v9 }
 0x333   : > { %355 = vrot.lane.b32.xlu0 %v645_v0, %s610_s27 }
 0x38a   : > { %v419_v10 = vpop.xlane.xlu0 %418 }
 0x38b   : > { %588 = vrcp.f32 %v419_v10  ;;  %v431_v15 = vand.u32 2147483648, %v419_v10  ;;  %v429_v17 = vand.u32 2147483647, %v419_v10  ;;  %vm425_vm10 = vweird.f32 %v419_v10 }
 0x38d   : > { %v432_v20 = vor.u32 1.1754944e-38, %v431_v15  ;;  %vm430_vm12 = vcmp.eq.f32.partialorder %v429_v17, 8.507059e+37 }
 0x391   : > { %v589_v11 = vpop.eup %588 }
 0x392   : > { %v421_v12 = vmul.f32 %v589_v11, %v419_v10  ;;  %v339_v13 = vpop.xlane.xlu0 %338  ;;  %vm426_vm9 = vweird.f32 %v589_v11 }
 0x393   : > { %590 = vrcp.f32 %v339_v13  ;;  %vm427_vm11 = vmor %vm425_vm10, %vm426_vm9  ;;  %v351_v25 = vand.u32 2147483648, %v339_v13  ;;  %v349_v27 = vand.u32 2147483647, %v339_v13  ;;  %vm345_vm14 = vweird.f32 %v339_v13 }
 0x394   : > { %v422_v14 = vsub.f32 1.0, %v421_v12 }
 0x395   : > { %v352_v29 = vor.u32 1.1754944e-38, %v351_v25  ;;  %vm350_vm1 = vcmp.eq.f32.partialorder %v349_v27, 8.507059e+37 }
 0x396   : > { %v423_v16 = vmul.f32 %v589_v11, %v422_v14 }
 0x398   : > { %v424_v18 = vadd.f32 %v589_v11, %v423_v16 }
 0x399   : > { %v591_v19 = vpop.eup %590 }
 0x39a   : > { %v341_v0 = vmul.f32 %v591_v19, %v339_v13  ;;  %v428_v21 = vsel %vm427_vm11, %v589_v11, %v424_v18  ;;  %vm346_vm13 = vweird.f32 %v591_v19 }
 0x39b   : > { %v433_v22 = vsel %vm430_vm12, %v432_v20, %v428_v21  ;;  %vm347_vm15 = vmor %vm345_vm14, %vm346_vm13 }
 0x39c   : > { %v342_v23 = vsub.f32 1.0, %v341_v0  ;;  %v434_v24 = vmul.f32 %v583_v57, %v433_v22 }
 0x39e   : > { %v343_v26 = vmul.f32 %v591_v19, %v342_v23  ;;  %551 = vmatmul.msk.f32.vlgmr.msrb.gmra.mxu2 %vm144_vm0, %v434_v24 }
 0x3a0   : > { %v344_v28 = vadd.f32 %v591_v19, %v343_v26 }
 0x3a2   : > { %v348_v30 = vsel %vm347_vm15, %v591_v19, %v344_v28 }
 0x3a3   : > { %v353_v31 = vsel %vm350_vm1, %v352_v29, %v348_v30 }
 0x3a4   : > { %v354_v32 = vmul.f32 %v587_v61, %v353_v31 }
 0x3a5   : > { %v356_v33 = vpop.permute.xlu0 %355 }
 0x3a6   : > { %376 = vmatpush.msrb.mxu3 %v356_v33 }
 0x3a7   : > { %548 = vmatmul.msk.f32.vlgmr.msrb.gmra.mxu3 %vm144_vm0, %v354_v32 }
 0x3a9   : > { %v298_v34 = vpop.f32.mrf.mxu3 }
 0x3aa   : > { %462 = vrot.lane.b32.xlu0 %v298_v34, %s611_s28 }
 0x41c   : > { %v463_v38 = vpop.permute.xlu0 %462 }
 0x41d   : > { %v473_v40 = vsel %vm144_vm0, %v676_v36, %v463_v38 }
 0x421   : > { %v458_v35 = vpop.f32.mrf.mxu2 }
 0x422   : > { %470 = vrot.lane.b32.xlu1 %v458_v35, %s612_s29 }
 0x42a   : > { %v378_v37 = vpop.f32.mrf.mxu3 }
 0x42b   : > { %466 = vrot.lane.b32.xlu2 %v378_v37, %s613_s30 }
 0x485   : > { %v467_v39 = vpop.permute.xlu2 %466 }
 0x486   : > { %v475_v41 = vsel %vm474_vm2, %v473_v40, %v467_v39 }
 0x494   : > { %v471_v42 = vpop.permute.xlu1 %470 }
 0x495   : > { %v477_v43 = vsel %vm476_vm3, %v475_v41, %v471_v42 }
 0x496   : > { %479 = vst.msk [vmem:[%s138_s5] sm:$0xff] %vm478_vm4, %v477_v43 }
 0x497 PF: > { %s12_s9 = sadd.s32 1, %s598_s9  }
 0x498   : > { %p9_p4 = scmp.ge.s32.totalorder %s12_s9, 4  }
 0x49a   :  { %11 = sbr.rel (!%p9_p4) target bundleno = 1 (0x1), region = 58 }

// kernel: text_encoder_forward.15
= control target key start
LH: loop header
LB: loop body
LE: loop exit
PB: predicated region body
PF: predicated region fallthrough
CT: control target
= control target key end

     0   :  { %s543_s18 = smov 0   ;;  %s545_s19 = smov 0   ;;  %s607_s0 = inlined_call_operand.vmem [shape: f32[2,8,32], index: 0, kind: input, shape index: {}]   ;;  %s608_s1 = inlined_call_operand.vmem [shape: f32[1,32], index: 1, kind: input, shape index: {}]   ;;  %s609_s2 = inlined_call_operand.vmem [shape: f32[1,32], index: 2, kind: input, shape index: {}]   ;;  %s610_s3 = inlined_call_operand.vmem [shape: f32[32,96], index: 3, kind: input, shape index: {}]   ;;  %s611_s4 = inlined_call_operand.vmem [shape: f32[1,96], index: 4, kind: input, shape index: {}]   ;;  %s612_s5 = inlined_call_operand.vmem [shape: f32[2,8,96], index: 5, kind: output, shape index: {}]  }
   0x1   :  { %s547_s20 = smov 0  }
   0x2 LB: > { %s27_s21 = sadd.s32 1, %s506_s19  ;;  %p450_p0 = scmp.ge.s32.totalorder %s510_s20, 1  ;;  %s510_s20 = sphi %s547_s20, %s15_s20   ;;  %s506_s19 = sphi %s545_s19, %s614_s19   ;;  %s502_s18 = sphi %s543_s18, %s613_s18  }
   0x3   : > { %p29_p1 = scmp.ge.s32.totalorder %s27_s21, 2  ;;  %p217_p2 = scmp.lt.s32.totalorder %s510_s20, 3 }
   0x5   : > { %s616_s21 = smov (%p29_p1, %s27_s21), 0  ;;  %p218_p3 = pnand %p450_p0, %p217_p2 }
   0x6   : > { %p253_p4 = scmp.lt.s32.totalorder (!%p218_p3), %s502_s18, 1 }
   0x7   : > { %221 = sbr.rel (%p218_p3) target bundleno = 413 (0x19d), region = 40 }
   0xc   : > { %s618_s18 = smov (!%p253_p4, %s502_s18), 1  ;;  %vm274_vm0 = vcmask 261120   ;;  %v512_v2 = vmov 32.0   ;;  %v315_v14 = vld [vmem:[%s610_s3 + $0x18] sm:$0xff]  ;;  %v314_v15 = vld [vmem:[%s610_s3 + $0x10] sm:$0xff]  ;;  %v313_v16 = vld [vmem:[%s610_s3 + $0x8] sm:$0xff] }
   0xd   : > { %s451_s22 = sshll.u32 %s618_s18, 3  ;;  %484 = vrcp.f32 %v512_v2  ;;  %335 = vmatpush.msra.mxu0 %v315_v14  ;;  %v312_v17 = vld [vmem:[%s610_s3] sm:$0xff]  ;;  %vm343_vm5 = vcmask 785408  }
   0xe   : > { %s256_s25 = scalar_lea.vmem %s607_s0, %s451_s22  ;;  %v481_v27 = vld [vmem:[%s608_s1] ss:$0 sm:$0xff]  ;;  %s270_s17 = scalar_lea.vmem %s612_s5, %s451_s22 }
   0xf   : > { %v271_v0 = vld [vmem:[%s256_s25] sm:$0xff]  ;;  %336 = vmatpush.msra.mxu0 %v314_v15 }
  0x10   : > { %v275_v1 = vsel %vm274_vm0, %v271_v0, 0.0  ;;  %v482_v30 = vld [vmem:[%s609_s2] ss:$0 sm:$0xff] }
  0x11   : > { %276 = vadd.xlane.f32.xlu0 %v275_v1  ;;  %337 = vmatpush.msra.mxu0 %v313_v16  ;;  %v483_v33 = vld [vmem:[%s611_s4] ss:$0 sm:$0xff] }
  0x13   : > { %v485_v3 = vpop.eup %484  ;;  %338 = vmatpush.msra.mxu0 %v312_v17 }
  0x14   : > { %v279_v4 = vmul.f32 32.0, %v485_v3  ;;  %vm283_vm1 = vweird.f32 %v485_v3 }
  0x16   : > { %v280_v5 = vsub.f32 1.0, %v279_v4 }
  0x18   : > { %v281_v6 = vmul.f32 %v485_v3, %v280_v5 }
  0x1a   : > { %v282_v7 = vadd.f32 %v485_v3, %v281_v6 }
  0x1c   : > { %v284_v8 = vsel %vm283_vm1, %v485_v3, %v282_v7 }
  0x84   : > { %v277_v9 = vpop.xlane.xlu0 %276 }
  0x85   : > { %v285_v10 = vmul.f32 %v284_v8, %v277_v9 }
  0x87   : > { %v286_v11 = vsub.f32 %v271_v0, %v285_v10 }
  0x89   : > { %v287_v12 = vmul.f32 %v286_v11, %v286_v11 }
  0x8b   : > { %v288_v13 = vsel %vm274_vm0, %v287_v12, 0.0 }
  0x8c   : > { %289 = vadd.xlane.f32.xlu0 %v288_v13 }
  0xff   : > { %v290_v18 = vpop.xlane.xlu0 %289 }
 0x100   : > { %v291_v19 = vmul.f32 %v290_v18, %v284_v8 }
 0x102   : > { %v292_v20 = vadd.f32 1e-05, %v291_v19 }
 0x104   : > { %486 = vrsqrt.f32 %v292_v20  ;;  %vm299_vm3 = vweird.f32 %v292_v20 }
 0x10a   : > { %v487_v21 = vpop.eup %486 }
 0x10b   : > { %v294_v22 = vmul.f32 %v487_v21, %v292_v20  ;;  %vm300_vm2 = vweird.f32 %v487_v21 }
 0x10c   : > { %vm301_vm4 = vmor %vm299_vm3, %vm300_vm2 }
 0x10d   : > { %v295_v23 = vmul.f32 %v487_v21, %v294_v22 }
 0x10f   : > { %v296_v24 = vmul.f32 0.5, %v295_v23 }
 0x111   : > { %v297_v25 = vsub.f32 1.5, %v296_v24 }
 0x113   : > { %v298_v26 = vmul.f32 %v487_v21, %v297_v25 }
 0x115   : > { %v302_v28 = vsel %vm301_vm4, %v487_v21, %v298_v26 }
 0x116   : > { %v303_v29 = vmul.f32 %v302_v28, %v286_v11 }
 0x118   : > { %v307_v31 = vmul.f32 %v481_v27, %v303_v29 }
 0x11a   : > { %v311_v32 = vadd.f32 %v482_v30, %v307_v31 }
 0x11c   : > { %453 = vmatmul.msk.f32.vlgmr.msra.gmra.mxu0 %vm274_vm0, %v311_v32 }
 0x199   : > { %v340_v34 = vpop.f32.mrf.mxu0 }
 0x19a   : > { %v341_v35 = vadd.f32 %v483_v33, %v340_v34 }
 0x19c   : > { %344 = vst.msk [vmem:[%s270_s17] sm:$0xff] %vm343_vm5, %v341_v35 }
 0x19d PF: > { %s15_s20 = sadd.s32 1, %s510_s20   ;;  %s613_s18 = smov %s506_s19 }
 0x19e   : > { %p12_p5 = scmp.ge.s32.totalorder %s15_s20, 4   ;;  %s614_s19 = smov %s616_s21 }
 0x1a0   :  { %14 = sbr.rel (!%p12_p5) target bundleno = 2 (0x2), region = 76 }

// kernel: text_encoder_forward.17
= control target key start
LH: loop header
LB: loop body
LE: loop exit
PB: predicated region body
PF: predicated region fallthrough
CT: control target
= control target key end

     0   :  { %s509_s15 = smov 0   ;;  %s511_s16 = smov 0   ;;  %s560_s0 = inlined_call_operand.vmem [shape: f32[2,8,32], index: 0, kind: input, shape index: {}]   ;;  %s561_s1 = inlined_call_operand.vmem [shape: f32[32,32], index: 1, kind: input, shape index: {}]   ;;  %s562_s2 = inlined_call_operand.vmem [shape: f32[1,32], index: 2, kind: input, shape index: {}]   ;;  %s563_s3 = inlined_call_operand.vmem [shape: f32[2,8,32], index: 3, kind: input, shape index: {}]   ;;  %s564_s4 = inlined_call_operand.vmem [shape: f32[2,8,32], index: 4, kind: output, shape index: {}]  }
   0x1   :  { %s513_s17 = smov 0  }
   0x2 LB: > { %s26_s18 = sadd.s32 1, %s478_s16  ;;  %p428_p0 = scmp.ge.s32.totalorder %s482_s17, 1  ;;  %s482_s17 = sphi %s513_s17, %s14_s17   ;;  %s478_s16 = sphi %s511_s16, %s566_s16   ;;  %s474_s15 = sphi %s509_s15, %s565_s15  }
   0x3   : > { %p28_p1 = scmp.ge.s32.totalorder %s26_s18, 2  ;;  %p206_p2 = scmp.lt.s32.totalorder %s482_s17, 3 }
   0x5   : > { %s568_s18 = smov (%p28_p1, %s26_s18), 0  ;;  %p207_p3 = pnand %p428_p0, %p206_p2 }
   0x6   : > { %p247_p4 = scmp.lt.s32.totalorder (!%p207_p3), %s474_s15, 1 }
   0x7   : > { %210 = sbr.rel (%p207_p3) target bundleno = 151 (0x97), region = 36 }
   0xc   : > { %v276_v0 = vld [vmem:[%s561_s1 + $0x18] sm:$0xff]  ;;  %v275_v1 = vld [vmem:[%s561_s1 + $0x10] sm:$0xff]  ;;  %v274_v2 = vld [vmem:[%s561_s1 + $0x8] sm:$0xff]  ;;  %s570_s15 = smov (!%p247_p4, %s474_s15), 1  ;;  %vm281_vm0 = vcmask 261120  }
   0xd   : > { %297 = vmatpush.msra.mxu0 %v276_v0  ;;  %v273_v3 = vld [vmem:[%s561_s1] sm:$0xff]  ;;  %s429_s27 = sshll.u32 %s570_s15, 3 }
   0xe   : > { %s250_s30 = scalar_lea.vmem %s560_s0, %s429_s27  ;;  %s264_s7 = scalar_lea.vmem %s563_s3, %s429_s27  ;;  %v459_v5 = vld [vmem:[%s562_s2] ss:$0 sm:$0xff] }
   0xf   : > { %298 = vmatpush.msra.mxu0 %v275_v1  ;;  %v272_v4 = vld [vmem:[%s250_s30] sm:$0xff]  ;;  %s271_s12 = scalar_lea.vmem %s564_s4, %s429_s27 }
  0x10   : > { %v305_v7 = vld [vmem:[%s264_s7] sm:$0xff] }
  0x11   : > { %299 = vmatpush.msra.mxu0 %v274_v2 }
  0x13   : > { %300 = vmatpush.msra.mxu0 %v273_v3 }
  0x14   : > { %432 = vmatmul.msk.f32.vlgmr.msra.gmra.mxu0 %vm281_vm0, %v272_v4 }
  0x91   : > { %v302_v6 = vpop.f32.mrf.mxu0 }
  0x92   : > { %v303_v8 = vadd.f32 %v459_v5, %v302_v6 }
  0x94   : > { %v306_v9 = vadd.f32 %v305_v7, %v303_v8 }
  0x96   : > { %307 = vst.msk [vmem:[%s271_s12] sm:$0xff] %vm281_vm0, %v306_v9 }
  0x97 PF: > { %s14_s17 = sadd.s32 1, %s482_s17   ;;  %s565_s15 = smov %s478_s16 }
  0x98   : > { %p11_p5 = scmp.ge.s32.totalorder %s14_s17, 4   ;;  %s566_s16 = smov %s568_s18 }
  0x9a   :  { %13 = sbr.rel (!%p11_p5) target bundleno = 2 (0x2), region = 75 }

// kernel: text_encoder_forward.14
= control target key start
LH: loop header
LB: loop body
LE: loop exit
PB: predicated region body
PF: predicated region fallthrough
CT: control target
= control target key end

     0   :  { %s543_s24 = smov 0   ;;  %s648_s0 = inlined_call_operand.vmem [shape: f32[2,8,32], index: 0, kind: input, shape index: {}]   ;;  %s649_s1 = inlined_call_operand.vmem [shape: f32[1,32], index: 1, kind: input, shape index: {}]   ;;  %s650_s2 = inlined_call_operand.vmem [shape: f32[1,32], index: 2, kind: input, shape index: {}]   ;;  %s651_s3 = inlined_call_operand.vmem [shape: f32[32,128], index: 3, kind: input, shape index: {}]   ;;  %s652_s4 = inlined_call_operand.vmem [shape: f32[1,128], index: 4, kind: input, shape index: {}]   ;;  %s653_s5 = inlined_call_operand.vmem [shape: f32[128,32], index: 5, kind: input, shape index: {}]   ;;  %s654_s6 = inlined_call_operand.vmem [shape: f32[1,32], index: 6, kind: input, shape index: {}]   ;;  %s655_s7 = inlined_call_operand.vmem [shape: f32[2,8,32], index: 7, kind: output, shape index: {}]  }
   0x1 LB: > { %s462_s25 = sadd.s32 4294967295, %s500_s24   ;;  %p466_p0 = scmp.ge.s32.totalorder %s500_s24, 1  ;;  %s500_s24 = sphi %s543_s24, %s17_s24  }
   0x2   : > { %p236_p1 = scmp.lt.s32.totalorder %s500_s24, 3 }
   0x4   : > { %p237_p2 = pnand %p466_p0, %p236_p1 }
   0x5   : > { %p266_p3 = scmp.lt.s32.totalorder (!%p237_p2), %s462_s25, 1 }
   0x6   : > { %240 = sbr.rel (%p237_p2) target bundleno = 574 (0x23e), region = 48 }
   0xb   : > { %s657_s25 = smov (!%p266_p3, %s462_s25), 1  ;;  %vm277_vm0 = vcmask 261120   ;;  %v502_v2 = vmov 32.0   ;;  %v318_v14 = vld [vmem:[%s651_s3 + $0x18] sm:$0xff]  ;;  %v317_v15 = vld [vmem:[%s651_s3 + $0x10] sm:$0xff]  ;;  %v316_v16 = vld [vmem:[%s651_s3 + $0x8] sm:$0xff] }
   0xc   : > { %s467_s26 = sshll.u32 %s657_s25, 3  ;;  %486 = vrcp.f32 %v502_v2  ;;  %338 = vmatpush.msra.mxu0 %v318_v14  ;;  %v315_v17 = vld [vmem:[%s651_s3] sm:$0xff]  ;;  %v382_v33 = vld [vmem:[%s653_s5 + $0x78] sm:$0xff]  ;;  %v381_v34 = vld [vmem:[%s653_s5 + $0x70] sm:$0xff] }
   0xd   : > { %s269_s29 = scalar_lea.vmem %s648_s0, %s467_s26  ;;  %v482_v27 = vld [vmem:[%s649_s1] ss:$0 sm:$0xff]  ;;  %387 = vmatpush.msra.mxu1 %v382_v33  ;;  %v380_v35 = vld [vmem:[%s653_s5 + $0x68] sm:$0xff]  ;;  %v378_v37 = vld [vmem:[%s653_s5 + $0x58] sm:$0xff]  ;;  %s273_s17 = scalar_lea.vmem %s655_s7, %s467_s26 }
   0xe   : > { %v559_v0 = vld [vmem:[%s269_s29] sm:$0xff]  ;;  %339 = vmatpush.msra.mxu0 %v317_v15  ;;  %v377_v38 = vld [vmem:[%s653_s5 + $0x50] sm:$0xff]  ;;  %v376_v39 = vld [vmem:[%s653_s5 + $0x48] sm:$0xff] }
   0xf   : > { %v278_v1 = vsel %vm277_vm0, %v559_v0, 0.0  ;;  %v483_v30 = vld [vmem:[%s650_s2] ss:$0 sm:$0xff]  ;;  %388 = vmatpush.msra.mxu1 %v381_v34  ;;  %v374_v41 = vld [vmem:[%s653_s5 + $0x38] sm:$0xff]  ;;  %v373_v42 = vld [vmem:[%s653_s5 + $0x30] sm:$0xff] }
  0x10   : > { %279 = vadd.xlane.f32.xlu0 %v278_v1  ;;  %340 = vmatpush.msra.mxu0 %v316_v16  ;;  %v379_v36 = vld [vmem:[%s653_s5 + $0x60] sm:$0xff]  ;;  %v372_v43 = vld [vmem:[%s653_s5 + $0x28] sm:$0xff]  ;;  %v370_v45 = vld [vmem:[%s653_s5 + $0x18] sm:$0xff] }
  0x11   : > { %389 = vmatpush.msra.mxu1 %v380_v35  ;;  %v375_v40 = vld [vmem:[%s653_s5 + $0x40] sm:$0xff]  ;;  %v369_v46 = vld [vmem:[%s653_s5 + $0x10] sm:$0xff]  ;;  %v368_v48 = vld [vmem:[%s653_s5 + $0x8] sm:$0xff] }
  0x12   : > { %v487_v3 = vpop.eup %486  ;;  %341 = vmatpush.msra.mxu0 %v315_v17  ;;  %v371_v44 = vld [vmem:[%s653_s5 + $0x20] sm:$0xff] }
  0x13   : > { %v282_v4 = vmul.f32 32.0, %v487_v3  ;;  %vm286_vm1 = vweird.f32 %v487_v3  ;;  %390 = vmatpush.msra.mxu1 %v379_v36  ;;  %v484_v47 = vld [vmem:[%s652_s4] ss:$0 sm:$0xff] }
  0x14   : > { %v367_v49 = vld [vmem:[%s653_s5] sm:$0xff] }
  0x15   : > { %v283_v5 = vsub.f32 1.0, %v282_v4  ;;  %391 = vmatpush.msra.mxu1 %v378_v37  ;;  %v485_v4 = vld [vmem:[%s654_s6] ss:$0 sm:$0xff] }
  0x17   : > { %v284_v6 = vmul.f32 %v487_v3, %v283_v5  ;;  %392 = vmatpush.msra.mxu1 %v377_v38 }
  0x19   : > { %v285_v7 = vadd.f32 %v487_v3, %v284_v6  ;;  %393 = vmatpush.msra.mxu1 %v376_v39 }
  0x1b   : > { %v287_v8 = vsel %vm286_vm1, %v487_v3, %v285_v7  ;;  %394 = vmatpush.msra.mxu1 %v375_v40 }
  0x1d   : > { %395 = vmatpush.msra.mxu1 %v374_v41 }
  0x1f   : > { %396 = vmatpush.msra.mxu1 %v373_v42 }
  0x21   : > { %397 = vmatpush.msra.mxu1 %v372_v43 }
  0x23   : > { %398 = vmatpush.msra.mxu1 %v371_v44 }
  0x25   : > { %399 = vmatpush.msra.mxu1 %v370_v45 }
  0x27   : > { %400 = vmatpush.msra.mxu1 %v369_v46 }
  0x29   : > { %401 = vmatpush.msra.mxu1 %v368_v48 }
  0x2b   : > { %402 = vmatpush.msra.mxu1 %v367_v49 }
  0x83   : > { %v280_v9 = vpop.xlane.xlu0 %279 }
  0x84   : > { %v288_v10 = vmul.f32 %v287_v8, %v280_v9 }
  0x86   : > { %v289_v11 = vsub.f32 %v559_v0, %v288_v10 }
  0x88   : > { %v290_v12 = vmul.f32 %v289_v11, %v289_v11 }
  0x8a   : > { %v291_v13 = vsel %vm277_vm0, %v290_v12, 0.0 }
  0x8b   : > { %292 = vadd.xlane.f32.xlu0 %v291_v13 }
  0xfe   : > { %v293_v18 = vpop.xlane.xlu0 %292 }
  0xff   : > { %v294_v19 = vmul.f32 %v293_v18, %v287_v8 }
 0x101   : > { %v295_v20 = vadd.f32 1e-05, %v294_v19 }
 0x103   : > { %488 = vrsqrt.f32 %v295_v20  ;;  %vm302_vm3 = vweird.f32 %v295_v20 }
 0x109   : > { %v489_v21 = vpop.eup %488 }
 0x10a   : > { %v297_v22 = vmul.f32 %v489_v21, %v295_v20  ;;  %vm303_vm2 = vweird.f32 %v489_v21 }
 0x10b   : > { %vm304_vm4 = vmor %vm302_vm3, %vm303_vm2 }
 0x10c   : > { %v298_v23 = vmul.f32 %v489_v21, %v297_v22 }
 0x10e   : > { %v299_v24 = vmul.f32 0.5, %v298_v23 }
 0x110   : > { %v300_v25 = vsub.f32 1.5, %v299_v24 }
 0x112   : > { %v301_v26 = vmul.f32 %v489_v21, %v300_v25 }
 0x114   : > { %v305_v28 = vsel %vm304_vm4, %v489_v21, %v301_v26 }
 0x115   : > { %v306_v29 = vmul.f32 %v305_v28, %v289_v11 }
 0x117   : > { %v310_v31 = vmul.f32 %v482_v27, %v306_v29 }
 0x119   : > { %v314_v32 = vadd.f32 %v483_v30, %v310_v31 }
 0x11b   : > { %469 = vmatmul.msk.f32.vlgmr.msra.gmra.mxu0 %vm277_vm0, %v314_v32 }
 0x198   : > { %v343_v50 = vpop.f32.mrf.mxu0 }
 0x199   : > { %v344_v51 = vadd.f32 %v484_v47, %v343_v50 }
 0x19b   : > { %v470_v52 = vmul.f32 -1.702, %v344_v51 }
 0x19d   : > { %v348_v53 = vmul.f32 1.442695, %v470_v52 }
 0x19f   : > { %490 = vpow2.f32 %v348_v53 }
 0x1a5   : > { %v491_v54 = vpop.eup %490 }
 0x1a6   : > { %v350_v55 = vadd.f32 1.0, %v491_v54 }
 0x1a8   : > { %492 = vrcp.f32 %v350_v55  ;;  %v362_v59 = vand.u32 2147483648, %v350_v55  ;;  %v360_v61 = vand.u32 2147483647, %v350_v55  ;;  %vm356_vm6 = vweird.f32 %v350_v55 }
 0x1aa   : > { %v363_v63 = vor.u32 1.1754944e-38, %v362_v59  ;;  %vm361_vm8 = vcmp.eq.f32.partialorder %v360_v61, 8.507059e+37 }
 0x1ae   : > { %v493_v56 = vpop.eup %492 }
 0x1af   : > { %v352_v57 = vmul.f32 %v493_v56, %v350_v55  ;;  %vm357_vm5 = vweird.f32 %v493_v56 }
 0x1b0   : > { %vm358_vm7 = vmor %vm356_vm6, %vm357_vm5 }
 0x1b1   : > { %v353_v58 = vsub.f32 1.0, %v352_v57 }
 0x1b3   : > { %v354_v60 = vmul.f32 %v493_v56, %v353_v58 }
 0x1b5   : > { %v355_v62 = vadd.f32 %v493_v56, %v354_v60 }
 0x1b7   : > { %v359_v1 = vsel %vm358_vm7, %v493_v56, %v355_v62 }
 0x1b8   : > { %v364_v2 = vsel %vm361_vm8, %v363_v63, %v359_v1 }
 0x1b9   : > { %v366_v3 = vmul.f32 %v364_v2, %v344_v51 }
 0x1bb   : > { %403 = vmatmul.f32.vlgmr.msra.gmra.mxu1 %v366_v3 }
 0x238   : > { %v404_v5 = vpop.f32.mrf.mxu1 }
 0x239   : > { %v405_v6 = vadd.f32 %v485_v4, %v404_v5 }
 0x23b   : > { %v407_v7 = vadd.f32 %v405_v6, %v559_v0 }
 0x23d   : > { %408 = vst.msk [vmem:[%s273_s17] sm:$0xff] %vm277_vm0, %v407_v7 }
 0x23e PF: > { %s17_s24 = sadd.s32 1, %s500_s24  }
 0x23f   : > { %p14_p4 = scmp.ge.s32.totalorder %s17_s24, 4  }
 0x241   :  { %16 = sbr.rel (!%p14_p4) target bundleno = 1 (0x1), region = 78 }

// kernel: text_encoder_forward.19
= control target key start
LH: loop header
LB: loop body
LE: loop exit
PB: predicated region body
PF: predicated region fallthrough
CT: control target
= control target key end

     0   :  { %vm21_vm0 = vcmask 254976   ;;  %s193_s0 = inlined_call_operand.vmem [shape: f32[2,32], index: 0, kind: input, shape index: {}]   ;;  %s194_s1 = inlined_call_operand.vmem [shape: f32[1,32], index: 1, kind: input, shape index: {}]   ;;  %s195_s2 = inlined_call_operand.vmem [shape: f32[1,32], index: 2, kind: input, shape index: {}]   ;;  %s196_s3 = inlined_call_operand.vmem [shape: f32[32,16], index: 3, kind: input, shape index: {}]   ;;  %s197_s4 = inlined_call_operand.hbm [shape: f32[2,16], index: 4, kind: output, shape index: {}]  }
   0x1   :  { %v18_v0 = vld [vmem:[%s193_s0] sm:$0x3] }
   0x2   :  { %v22_v1 = vsel %vm21_vm0, %v18_v0, 0.0 }
   0x3   :  { %9 = vsyncpa [#allocation3], 0  ;;  %23 = vadd.xlane.f32.xlu0 %v22_v1  ;;  %v140_v2 = vmov 32.0   ;;  %v62_v14 = vld [vmem:[%s196_s3 + $0x18] sm:$0xff]  ;;  %v61_v15 = vld [vmem:[%s196_s3 + $0x10] sm:$0xff]  ;;  %vm63_vm5 = vcmask 261120  }
   0x4   :  { %110 = vrcp.f32 %v140_v2  ;;  %79 = vmatpush.msra.mxu0 %v62_v14  ;;  %v60_v16 = vld [vmem:[%s196_s3 + $0x8] sm:$0xff]  ;;  %v59_v17 = vld [vmem:[%s196_s3] sm:$0xff]  ;;  %s141_s27 = smov [#allocation2]   ;;  %s96_s5 = sshll.u32 %s197_s4, 4  ;;  %vm87_vm6 = vcmask 123904   ;;  %s97_s5 = int_to_ptr.hbm [resolvable:$true] %s96_s5 }
   0x5   :  { %v108_v27 = vld [vmem:[%s194_s1] ss:$0 sm:$0xff]  ;;  %s94_s28 = sshll.u32 %s141_s27, 4  ;;  %s95_s28 = int_to_ptr.vmem [resolvable:$true] %s94_s28 }
   0x6   :  { %80 = vmatpush.msra.mxu0 %v61_v15  ;;  %v109_v30 = vld [vmem:[%s195_s2] ss:$0 sm:$0xff] }
   0x8   :  { %81 = vmatpush.msra.mxu0 %v60_v16 }
   0xa   :  { %v111_v3 = vpop.eup %110  ;;  %82 = vmatpush.msra.mxu0 %v59_v17 }
   0xb   :  { %v26_v4 = vmul.f32 32.0, %v111_v3  ;;  %vm30_vm1 = vweird.f32 %v111_v3 }
   0xd   :  { %v27_v5 = vsub.f32 1.0, %v26_v4 }
   0xf   :  { %v28_v6 = vmul.f32 %v111_v3, %v27_v5 }
  0x11   :  { %v29_v7 = vadd.f32 %v111_v3, %v28_v6 }
  0x13   :  { %v31_v8 = vsel %vm30_vm1, %v111_v3, %v29_v7 }
  0x76   :  { %v24_v9 = vpop.xlane.xlu0 %23 }
  0x77   :  { %v32_v10 = vmul.f32 %v31_v8, %v24_v9 }
  0x79   :  { %v33_v11 = vsub.f32 %v18_v0, %v32_v10 }
  0x7b   :  { %v34_v12 = vmul.f32 %v33_v11, %v33_v11 }
  0x7d   :  { %v35_v13 = vsel %vm21_vm0, %v34_v12, 0.0 }
  0x7e   :  { %36 = vadd.xlane.f32.xlu0 %v35_v13 }
  0xf1   :  { %v37_v18 = vpop.xlane.xlu0 %36 }
  0xf2   :  { %v38_v19 = vmul.f32 %v37_v18, %v31_v8 }
  0xf4   :  { %v39_v20 = vadd.f32 1e-05, %v38_v19 }
  0xf6   :  { %112 = vrsqrt.f32 %v39_v20  ;;  %vm46_vm3 = vweird.f32 %v39_v20 }
  0xfc   :  { %v113_v21 = vpop.eup %112 }
  0xfd   :  { %v41_v22 = vmul.f32 %v113_v21, %v39_v20  ;;  %vm47_vm2 = vweird.f32 %v113_v21 }
  0xfe   :  { %vm48_vm4 = vmor %vm46_vm3, %vm47_vm2 }
  0xff   :  { %v42_v23 = vmul.f32 %v113_v21, %v41_v22 }
 0x101   :  { %v43_v24 = vmul.f32 0.5, %v42_v23 }
 0x103   :  { %v44_v25 = vsub.f32 1.5, %v43_v24 }
 0x105   :  { %v45_v26 = vmul.f32 %v113_v21, %v44_v25 }
 0x107   :  { %v49_v28 = vsel %vm48_vm4, %v113_v21, %v45_v26 }
 0x108   :  { %v50_v29 = vmul.f32 %v49_v28, %v33_v11 }
 0x10a   :  { %v54_v31 = vmul.f32 %v108_v27, %v50_v29 }
 0x10c   :  { %v58_v32 = vadd.f32 %v109_v30, %v54_v31 }
 0x10e   :  { %105 = vmatmul.msk.f32.vlgmr.msra.gmra.mxu0 %vm63_vm5, %v58_v32 }
 0x18b   :  { %v84_v33 = vpop.f32.mrf.mxu0 }
 0x18c   :  { %88 = vst.msk [vmem:[#allocation2] sm:$0x3] %vm87_vm6, %v84_v33 }
 0x18d   :  { %99 = dma.vmem_to_hbm [thread:$0]  %s95_s28, 32, %s97_s5, [#allocation3]  }
 0x18e   :  { %138 = dma.done.wait [#allocation3], 32  }
 0x18f   :  { %139 = vsyncadd [#allocation3], 4294967264 }
 0x190   :  { %104 = vsyncpa [#allocation3], 1 }

</bundles_post_ra>
